<compile_context>
chip_gen: v6e
topology: v6e:2x2x1
jax: 0.10.0
libtpu: 0.0.40
codegen_flags: <defaults>
</compile_context>

<pallas_src>
import numpy as np
import jax
import jax.numpy as jnp
from jax import lax
from jax.experimental import pallas as pl
from jax.experimental.pallas import tpu as pltpu

# Shapes implied by the module: Linear(16*16*16, 10) after a /2 pool => 32x32 input.
B, CIN, H, W = 2, 3, 32, 32
COUT, K = 16, 3
PH, PW = H // 2, W // 2                  # pooled spatial (16, 16)
FC_IN, FC_OUT = COUT * PH * PW, 10       # 4096 -> 10
FC_PAD = 16                              # FC outputs padded 10 -> 16 (see header note)
HP, WP = H + 2, W + 2                    # padded spatial (34, 34)
ROW_FEATS = WP * CIN                     # 102 = one padded input row, (col, cin) flattened
ROW_PAD = 128                            # lane-padded row features (exact vreg width)
LANES_CONV = 2 * PW * COUT               # 512 = (col_parity, pooled_col, cout) in lanes


def fused_cnn_kernel(xrs_ref, tw_ref, cb_ref, wf_ref, fb_ref, o_ref):
    # Per grid step = one image b:
    # xrs_ref: (2, 1, 17, 128) f32   padded rows of image b, split by row parity, lane-padded
    # tw_ref : (384, 512)      bf16  Toeplitz conv weights, kh slabs stacked on contraction dim
    # cb_ref : (1, 256)        f32   conv bias tiled over pooled columns
    # wf_ref : (4096, 16)      bf16  fc weights, rows ordered (pooled_row, pooled_col, cout)
    # fb_ref : (1, 16)         f32   fc bias (padded with zeros)
    # o_ref  : (1, 1, 16)      f32

    # Build the (2*PH, K*ROW_PAD) conv lhs: rows = (row_parity a, pooled_row i),
    # contraction lanes = (kh, padded (col, cin)).  All slices are static and
    # 8/128-aligned -> pure vreg placement, no relayout.
    row_blocks = []
    for a in range(2):
        per_kh = [xrs_ref[(a + kh) % 2, 0, (a + kh) // 2:(a + kh) // 2 + PH, :]
                  for kh in range(K)]
        row_blocks.append(jnp.concatenate(per_kh, axis=1))           # (16, 384)
    lhs = jnp.concatenate(row_blocks, axis=0).astype(jnp.bfloat16)   # (32, 384)

    # Convolution for all 1024 output pixels of this image: ONE bf16 MXU matmul, f32 acc.
    acc = jnp.dot(lhs, tw_ref[...], preferred_element_type=jnp.float32)   # (32, 512) f32

    # 2x2 max pool = row-parity max (sublane halves) + col-parity max (lane halves).
    m = jnp.maximum(acc[:PH], acc[PH:])                               # (16, 512)
    m = jnp.maximum(m[:, :PW * COUT], m[:, PW * COUT:])               # (16, 256)
    # bias + ReLU hoisted after the maxes (bias constant per window, ReLU monotone)
    pooled = jnp.maximum(m + cb_ref[...], 0.0)                        # (16, 256) f32

    # FC on the MXU: flatten (i, j, c) -> 4096 contraction lanes, one matmul.
    p2 = pooled.reshape(1, FC_IN).astype(jnp.bfloat16)                # (1, 4096) bf16
    o_ref[0] = (jnp.dot(p2, wf_ref[...], preferred_element_type=jnp.float32)
                + fb_ref[...])                                        # (1, 16)


def prepare_params(conv_w, conv_b, fc_w, fc_b):
    """Precompute kernel-side weight layouts once (kept outside the jitted forward)."""
    cw = np.asarray(conv_w, np.float32)          # (COUT, CIN, K, K)
    cb = np.asarray(conv_b, np.float32)          # (COUT,)
    fw = np.asarray(fc_w, np.float32)            # (FC_OUT, FC_IN)
    fb = np.asarray(fc_b, np.float32)            # (FC_OUT,)

    # Toeplitz conv weights, kh slabs stacked on the (lane-padded) contraction dim:
    # tw[kh*128 + col*CIN + ci, sp*(PW*COUT) + j*COUT + c] = conv_w[c, ci, kh, col-(2j+sp)]
    tw = np.zeros((K * ROW_PAD, LANES_CONV), np.float32)
    for kh in range(K):
        for sp in range(2):                      # output-column parity
            for j in range(PW):                  # pooled column
                for kw in range(K):
                    col = 2 * j + sp + kw        # padded input column (< 34)
                    base = sp * PW * COUT + j * COUT
                    for ci in range(CIN):
                        tw[kh * ROW_PAD + col * CIN + ci, base:base + COUT] = cw[:, ci, kh, kw]

    # conv bias tiled over pooled-column lane groups: cb_tiled[j*COUT + c] = conv_b[c]
    cb_tiled = np.tile(cb, PW).reshape(1, PW * COUT)

    # fc weight: torch flatten order is (cout, i, j); kernel contraction order is
    # (i, j, c) -> wf[i*256 + j*16 + c, o], out dim zero-padded 10 -> 16.
    wf = (fw.reshape(FC_OUT, COUT, PH, PW)
            .transpose(0, 2, 3, 1)               # [o, i, j, c]
            .reshape(FC_OUT, FC_IN).T)           # (FC_IN, FC_OUT)
    wf_pad = np.zeros((FC_IN, FC_PAD), np.float32)
    wf_pad[:, :FC_OUT] = wf

    fb_pad = np.zeros((1, FC_PAD), np.float32)
    fb_pad[0, :FC_OUT] = fb

    return (jnp.asarray(tw, jnp.bfloat16),        # bf16: halves dominant weight DMA
            jnp.asarray(cb_tiled, jnp.float32),
            jnp.asarray(wf_pad, jnp.bfloat16),
            jnp.asarray(fb_pad, jnp.float32))


def simple_cnn_forward(x_nchw, tw, cb, wf, fb):
    # Layout glue (~35 KB): NCHW -> padded NHWC -> row-parity split, each padded
    # row flattened to (col, cin) lanes and zero-padded 102 -> 128 lanes.
    xp = jnp.pad(jnp.transpose(x_nchw, (0, 2, 3, 1)),
                 ((0, 0), (1, 1), (1, 1), (0, 0)))                    # (B, 34, 34, 3)
    xr = jnp.pad(xp.reshape(B, HP, ROW_FEATS),
                 ((0, 0), (0, 0), (0, ROW_PAD - ROW_FEATS)))          # (B, 34, 128)
    xrs = xr.reshape(B, HP // 2, 2, ROW_PAD).transpose(2, 0, 1, 3)    # (2, B, 17, 128)

    out = pl.pallas_call(
        fused_cnn_kernel,
        out_shape=jax.ShapeDtypeStruct((B, 1, FC_PAD), jnp.float32),
        grid=(B,),
        in_specs=[pl.BlockSpec((2, 1, HP // 2, ROW_PAD), lambda b: (0, b, 0, 0)),
                  pl.BlockSpec((K * ROW_PAD, LANES_CONV), lambda b: (0, 0)),
                  pl.BlockSpec((1, PW * COUT), lambda b: (0, 0)),
                  pl.BlockSpec((FC_IN, FC_PAD), lambda b: (0, 0)),
                  pl.BlockSpec((1, FC_PAD), lambda b: (0, 0))],
        out_specs=pl.BlockSpec((1, 1, FC_PAD), lambda b: (b, 0, 0)),
        compiler_params=pltpu.CompilerParams(
            # batch axis is embarrassingly parallel -> v7x megacore split;
            # on v5e/v6e it is a 2-step loop with resident (constant-index) weights.
            dimension_semantics=("parallel",),
            # let XLA fuse the pad/parity-split glue into the pallas operand
            allow_input_fusion=[True, False, False, False, False]),
    )(xrs, tw, cb, wf, fb)
    return out.reshape(B, FC_PAD)[:, :FC_OUT]


def reference_forward(x_nchw, conv_w, conv_b, fc_w, fc_b):
    y = lax.conv_general_dilated(
        x_nchw, conv_w, window_strides=(1, 1), padding=((1, 1), (1, 1)),
        dimension_numbers=("NCHW", "OIHW", "NCHW"),
        precision=lax.Precision.HIGHEST)
    y = jnp.maximum(y + conv_b.reshape(1, COUT, 1, 1), 0.0)
    y = lax.reduce_window(y, -jnp.inf, lax.max,
                          (1, 1, 2, 2), (1, 1, 2, 2), "VALID")
    flat = y.reshape(B, FC_IN)                   # NCHW flatten, like torch .view
    return jnp.dot(flat, fc_w.T, precision=lax.Precision.HIGHEST) + fc_b


if __name__ == "__main__":
    key = jax.random.PRNGKey(0)
    kx, kw1, kb1, kw2, kb2 = jax.random.split(key, 5)

    x = jax.random.normal(kx, (B, CIN, H, W), jnp.float32)
    conv_w = 0.1 * jax.random.normal(kw1, (COUT, CIN, K, K), jnp.float32)
    conv_b = 0.1 * jax.random.normal(kb1, (COUT,), jnp.float32)
    fc_w = 0.02 * jax.random.normal(kw2, (FC_OUT, FC_IN), jnp.float32)
    fc_b = 0.02 * jax.random.normal(kb2, (FC_OUT,), jnp.float32)

    params = prepare_params(conv_w, conv_b, fc_w, fc_b)   # cached once, outside jit
    fwd = jax.jit(simple_cnn_forward)
    out = jax.block_until_ready(fwd(x, *params))

    ref = reference_forward(x, conv_w, conv_b, fc_w, fc_b)
    assert out.shape == (B, FC_OUT)
    # tolerance widened slightly (1e-2 -> 2e-2) to cover bf16 weights with f32 accumulation
    assert jnp.allclose(out, ref, rtol=2e-2, atol=2e-2), "mismatch vs reference"

    print("KERNEL_OK")
</pallas_src>

<mosaic_0001>
module attributes {stable_mosaic.version = 11 : i64} {
  func.func @fused_cnn_kernel(%arg0: i32, %arg1: memref<2x1x17x128xf32, #tpu.memory_space<vmem>>, %arg2: memref<384x512xbf16, #tpu.memory_space<vmem>>, %arg3: memref<1x256xf32, #tpu.memory_space<vmem>>, %arg4: memref<4096x16xbf16, #tpu.memory_space<vmem>>, %arg5: memref<1x16xf32, #tpu.memory_space<vmem>>, %arg6: memref<1x1x16xf32, #tpu.memory_space<vmem>>) attributes {dimension_semantics = [#tpu.dimension_semantics<parallel>], iteration_bounds = array<i64: 2>, scalar_prefetch = 0 : i64, scratch_operands = 0 : i64, tpu.core_type = #tpu.core_type<tc>, window_params = [{transform_indices = @transform_0, window_bounds = array<i64: 2, 1, 17, 128>}, {pipeline_mode = #tpu.pipeline_mode<synchronous>, transform_indices = @transform_1, window_bounds = array<i64: 384, 512>}, {pipeline_mode = #tpu.pipeline_mode<synchronous>, transform_indices = @transform_2, window_bounds = array<i64: 1, 256>}, {pipeline_mode = #tpu.pipeline_mode<synchronous>, transform_indices = @transform_3, window_bounds = array<i64: 4096, 16>}, {pipeline_mode = #tpu.pipeline_mode<synchronous>, transform_indices = @transform_4, window_bounds = array<i64: 1, 16>}, {transform_indices = @transform_5, window_bounds = array<i64: 1, 1, 16>}]} {
    %c0 = arith.constant 0 : index
    %c0_0 = arith.constant 0 : index
    %c0_1 = arith.constant 0 : index
    %c0_2 = arith.constant 0 : index
    %0 = vector.load %arg1[%c0, %c0_0, %c0_1, %c0_2] : memref<2x1x17x128xf32, #tpu.memory_space<vmem>>, vector<1x1x16x128xf32>
    %1 = vector.shape_cast %0 : vector<1x1x16x128xf32> to vector<16x128xf32>
    %c1 = arith.constant 1 : index
    %c0_3 = arith.constant 0 : index
    %c0_4 = arith.constant 0 : index
    %c0_5 = arith.constant 0 : index
    %2 = vector.load %arg1[%c1, %c0_3, %c0_4, %c0_5] : memref<2x1x17x128xf32, #tpu.memory_space<vmem>>, vector<1x1x16x128xf32>
    %3 = vector.shape_cast %2 : vector<1x1x16x128xf32> to vector<16x128xf32>
    %c0_6 = arith.constant 0 : index
    %c0_7 = arith.constant 0 : index
    %c1_8 = arith.constant 1 : index
    %c0_9 = arith.constant 0 : index
    %4 = vector.load %arg1[%c0_6, %c0_7, %c1_8, %c0_9] : memref<2x1x17x128xf32, #tpu.memory_space<vmem>>, vector<1x1x16x128xf32>
    %5 = vector.shape_cast %4 : vector<1x1x16x128xf32> to vector<16x128xf32>
    %6 = tpu.concatenate %1, %3, %5 in 1 : vector<16x128xf32>, vector<16x128xf32>, vector<16x128xf32> -> vector<16x384xf32>
    %c1_10 = arith.constant 1 : index
    %c0_11 = arith.constant 0 : index
    %c0_12 = arith.constant 0 : index
    %c0_13 = arith.constant 0 : index
    %7 = vector.load %arg1[%c1_10, %c0_11, %c0_12, %c0_13] : memref<2x1x17x128xf32, #tpu.memory_space<vmem>>, vector<1x1x16x128xf32>
    %8 = vector.shape_cast %7 : vector<1x1x16x128xf32> to vector<16x128xf32>
    %c0_14 = arith.constant 0 : index
    %c0_15 = arith.constant 0 : index
    %c1_16 = arith.constant 1 : index
    %c0_17 = arith.constant 0 : index
    %9 = vector.load %arg1[%c0_14, %c0_15, %c1_16, %c0_17] : memref<2x1x17x128xf32, #tpu.memory_space<vmem>>, vector<1x1x16x128xf32>
    %10 = vector.shape_cast %9 : vector<1x1x16x128xf32> to vector<16x128xf32>
    %c1_18 = arith.constant 1 : index
    %c0_19 = arith.constant 0 : index
    %c1_20 = arith.constant 1 : index
    %c0_21 = arith.constant 0 : index
    %11 = vector.load %arg1[%c1_18, %c0_19, %c1_20, %c0_21] : memref<2x1x17x128xf32, #tpu.memory_space<vmem>>, vector<1x1x16x128xf32>
    %12 = vector.shape_cast %11 : vector<1x1x16x128xf32> to vector<16x128xf32>
    %13 = tpu.concatenate %8, %10, %12 in 1 : vector<16x128xf32>, vector<16x128xf32>, vector<16x128xf32> -> vector<16x384xf32>
    %14 = tpu.concatenate %6, %13 in 0 : vector<16x384xf32>, vector<16x384xf32> -> vector<32x384xf32>
    %15 = arith.truncf %14 : vector<32x384xf32> to vector<32x384xbf16>
    %c0_22 = arith.constant 0 : index
    %c0_23 = arith.constant 0 : index
    %16 = vector.load %arg2[%c0_22, %c0_23] : memref<384x512xbf16, #tpu.memory_space<vmem>>, vector<384x512xbf16>
    %cst = arith.constant dense<0.000000e+00> : vector<32x512xf32>
    %17 = tpu.matmul %15, %16, %cst {dimension_numbers = #tpu.dot_dimension_numbers<[1], [0], [0], [1], [0, 0, 1, 1], [], []>} : vector<32x384xbf16>, vector<384x512xbf16>, vector<32x512xf32> -> vector<32x512xf32>
    %18 = vector.extract_strided_slice %17 {offsets = [0, 0], sizes = [16, 512], strides = [1, 1]} : vector<32x512xf32> to vector<16x512xf32>
    %19 = vector.extract_strided_slice %17 {offsets = [16, 0], sizes = [16, 512], strides = [1, 1]} : vector<32x512xf32> to vector<16x512xf32>
    %20 = arith.maximumf %18, %19 : vector<16x512xf32>
    %21 = vector.extract_strided_slice %20 {offsets = [0, 0], sizes = [16, 256], strides = [1, 1]} : vector<16x512xf32> to vector<16x256xf32>
    %22 = vector.extract_strided_slice %20 {offsets = [0, 256], sizes = [16, 256], strides = [1, 1]} : vector<16x512xf32> to vector<16x256xf32>
    %23 = arith.maximumf %21, %22 : vector<16x256xf32>
    %c0_24 = arith.constant 0 : index
    %c0_25 = arith.constant 0 : index
    %24 = vector.load %arg3[%c0_24, %c0_25] : memref<1x256xf32, #tpu.memory_space<vmem>>, vector<1x256xf32>
    %25 = vector.broadcast %24 : vector<1x256xf32> to vector<16x256xf32>
    %26 = arith.addf %23, %25 : vector<16x256xf32>
    %cst_26 = arith.constant 0.000000e+00 : f32
    %27 = vector.broadcast %cst_26 : f32 to vector<16x256xf32>
    %28 = arith.maximumf %26, %27 : vector<16x256xf32>
    %29 = vector.shape_cast %28 : vector<16x256xf32> to vector<1x4096xf32>
    %30 = arith.truncf %29 : vector<1x4096xf32> to vector<1x4096xbf16>
    %c0_27 = arith.constant 0 : index
    %c0_28 = arith.constant 0 : index
    %31 = vector.load %arg4[%c0_27, %c0_28] : memref<4096x16xbf16, #tpu.memory_space<vmem>>, vector<4096x16xbf16>
    %cst_29 = arith.constant dense<0.000000e+00> : vector<1x16xf32>
    %32 = tpu.matmul %30, %31, %cst_29 {dimension_numbers = #tpu.dot_dimension_numbers<[1], [0], [0], [1], [0, 0, 1, 1], [], []>} : vector<1x4096xbf16>, vector<4096x16xbf16>, vector<1x16xf32> -> vector<1x16xf32>
    %c0_30 = arith.constant 0 : index
    %c0_31 = arith.constant 0 : index
    %33 = vector.load %arg5[%c0_30, %c0_31] : memref<1x16xf32, #tpu.memory_space<vmem>>, vector<1x16xf32>
    %34 = arith.addf %32, %33 : vector<1x16xf32>
    %c0_32 = arith.constant 0 : index
    %c0_33 = arith.constant 0 : index
    %c0_34 = arith.constant 0 : index
    %35 = vector.load %arg6[%c0_32, %c0_33, %c0_34] : memref<1x1x16xf32, #tpu.memory_space<vmem>>, vector<1x1x16xf32>
    %36 = vector.shape_cast %35 : vector<1x1x16xf32> to vector<1x16xf32>
    %37 = vector.shape_cast %34 : vector<1x16xf32> to vector<1x1x16xf32>
    tpu.vector_store %arg6[%c0_32, %c0_33, %c0_34], %37 {strides = array<i32>} : memref<1x1x16xf32, #tpu.memory_space<vmem>>, vector<1x1x16xf32>,
    return
  }
  func.func @transform_0(%arg0: i32) -> (i32, i32, i32, i32) {
    %c0_i32 = arith.constant 0 : i32
    %c0_i32_0 = arith.constant 0 : i32
    %c0_i32_1 = arith.constant 0 : i32
    %c0_i32_2 = arith.constant 0 : i32
    return %c0_i32, %arg0, %c0_i32_0, %c0_i32_1 : i32, i32, i32, i32
  }
  func.func @transform_1(%arg0: i32) -> (i32, i32) {
    %c0_i32 = arith.constant 0 : i32
    %c0_i32_0 = arith.constant 0 : i32
    %c0_i32_1 = arith.constant 0 : i32
    return %c0_i32, %c0_i32_0 : i32, i32
  }
  func.func @transform_2(%arg0: i32) -> (i32, i32) {
    %c0_i32 = arith.constant 0 : i32
    %c0_i32_0 = arith.constant 0 : i32
    %c0_i32_1 = arith.constant 0 : i32
    return %c0_i32, %c0_i32_0 : i32, i32
  }
  func.func @transform_3(%arg0: i32) -> (i32, i32) {
    %c0_i32 = arith.constant 0 : i32
    %c0_i32_0 = arith.constant 0 : i32
    %c0_i32_1 = arith.constant 0 : i32
    return %c0_i32, %c0_i32_0 : i32, i32
  }
  func.func @transform_4(%arg0: i32) -> (i32, i32) {
    %c0_i32 = arith.constant 0 : i32
    %c0_i32_0 = arith.constant 0 : i32
    %c0_i32_1 = arith.constant 0 : i32
    return %c0_i32, %c0_i32_0 : i32, i32
  }
  func.func @transform_5(%arg0: i32) -> (i32, i32, i32) {
    %c0_i32 = arith.constant 0 : i32
    %c0_i32_0 = arith.constant 0 : i32
    %c0_i32_1 = arith.constant 0 : i32
    return %arg0, %c0_i32, %c0_i32_0 : i32, i32, i32
  }
}

</mosaic_0001>

<bundles_post_ra>
// kernel: simple_cnn_forward.2
= control target key start
LH: loop header
LB: loop body
LE: loop exit
PB: predicated region body
PF: predicated region fallthrough
CT: control target
= control target key end

     0   :  { %10 = vsyncpa [#allocation3], 0  ;;  %s6688_s0 = inlined_call_operand.vmem [shape: bf16[384,512], index: 0, kind: input, shape index: {}]   ;;  %s6689_s1 = inlined_call_operand.vmem [shape: f32[1,256], index: 1, kind: input, shape index: {}]   ;;  %s6690_s2 = inlined_call_operand.vmem [shape: bf16[4096,16], index: 2, kind: input, shape index: {}]   ;;  %s6691_s3 = inlined_call_operand.vmem [shape: f32[1,16], index: 3, kind: input, shape index: {}]   ;;  %s6692_s4 = inlined_call_operand.vmem [shape: f32[2,17,2,128], index: 4, kind: input, shape index: {}]   ;;  %s6693_s5 = inlined_call_operand.hbm [shape: f32[2,1,16], index: 5, kind: output, shape index: {}]  }
   0x1   :  { %12 = vsyncpa [#allocation3 + $0x1], 0  ;;  %s5339_s18 = smov 0   ;;  %s5341_s19 = smov 0  }
   0x2   :  { %s5343_s20 = smov 0   ;;  %s5345_s21 = smov 0  }
   0x3 LB: > { %s5360_s22 = sadd.s32 4294967295, %s5304_s21   ;;  %s4085_s23 = sadd.s32 4294967294, %s5304_s21   ;;  %s5304_s21 = sphi %s5345_s21, %s6699_s21   ;;  %s5300_s20 = sphi %s5343_s20, %s6698_s20   ;;  %s5296_s19 = sphi %s5341_s19, %s6697_s19   ;;  %s5292_s18 = sphi %s5339_s18, %s6696_s18  }
   0x4   : > { %s5364_s24 = sadd.s32 1, %s5304_s21   ;;  %s135_s25 = sadd.s32 1, %s5300_s20 }
   0x5   : > { %s132_s26 = ssub.s32 %s5304_s21, %s5364_s24  ;;  %p145_p0 = scmp.ne.s32.totalorder %s5300_s20, %s5296_s19 }
   0x6   : > { %p133_p1 = scmp.eq.s32.totalorder %s132_s26, 0  ;;  %p146_p2 = scmp.eq.s32.totalorder %s5360_s22, 1 }
   0x7   : > { %p151_p3 = scmp.ne.s32.totalorder %s5296_s19, %s5292_s18  ;;  %p152_p4 = scmp.eq.s32.totalorder %s4085_s23, 1 }
   0x8   : > { %s5375_s27 = scalar_select %p133_p1, %s5300_s20, %s135_s25  }
   0x9   : > { %p5377_p5 = por %p146_p2, %p145_p0  ;;  %p5381_p6 = por %p152_p4, %p151_p3 }
   0xa   : > { %p4088_p7 = scmp.ge.s32.totalorder %s5304_s21, 1  ;;  %p190_p8 = scmp.lt.s32.totalorder %s5304_s21, 3 }
   0xc   : > { %p191_p9 = pnand %p4088_p7, %p190_p8 }
   0xe   : > { %194 = sbr.rel (%p191_p9) target bundleno = 777 (0x309), region = 40 }
  0x13   : > { %v4844_v0 = vld [vmem:[%s6688_s0 + $0xe4] ss:$16 sps:$4 sm:$0xff]   ;;  %v5306_v2 = vmov 0   ;;  %v4848_v3 = vld [vmem:[%s6688_s0 + $0xe0] ss:$16 sps:$4 sm:$0xff]   ;;  %p217_p10 = scmp.lt.s32.totalorder %s5360_s22, 1 }
  0x14   : > { %v4846_v1 = vld [vmem:[%s6688_s0 + $0x2e4] ss:$16 sps:$4 sm:$0xff]   ;;  %931 = vmatprep.mubr.bf16.mxu1 %v5306_v2  ;;  %846 = vmatprep.subr.bf16.mxu0 %v4844_v0  ;;  %v4849_v4 = vld [vmem:[%s6688_s0 + $0x2e0] ss:$16 sps:$4 sm:$0xff]   ;;  %v4896_v37 = vld [vmem:[%s6688_s0 + $0xec] ss:$16 sps:$4 sm:$0xff]  }
  0x15   : > { %899 = vmatprep.subr.bf16.mxu1 %v4846_v1  ;;  %v4850_v5 = vld [vmem:[%s6688_s0 + $0xc4] ss:$16 sps:$4 sm:$0xff]   ;;  %847 = vmatpush1.bf16.msra.mxu0 %v4848_v3  ;;  %v4854_v7 = vld [vmem:[%s6688_s0 + $0xc0] ss:$16 sps:$4 sm:$0xff]   ;;  %s218_s25 = scalar_select %p217_p10, %s5360_s22, 1  ;;  %vm4015_vm0 = vcmask 122880  }
  0x16   : > { %900 = vmatpush1.bf16.msra.mxu1 %v4849_v4  ;;  %v4852_v6 = vld [vmem:[%s6688_s0 + $0x2c4] ss:$16 sps:$4 sm:$0xff]   ;;  %848 = vmatprep.subr.bf16.mxu0 %v4850_v5  ;;  %v4855_v8 = vld [vmem:[%s6688_s0 + $0x2c0] ss:$16 sps:$4 sm:$0xff]   ;;  %v4894_v40 = vld [vmem:[%s6688_s0 + $0xe8] ss:$16 sps:$4 sm:$0xff]  }
  0x17   : > { %901 = vmatprep.subr.bf16.mxu1 %v4852_v6  ;;  %v4856_v9 = vld [vmem:[%s6688_s0 + $0xa4] ss:$16 sps:$4 sm:$0xff]   ;;  %v4860_v11 = vld [vmem:[%s6688_s0 + $0xa0] ss:$16 sps:$4 sm:$0xff]   ;;  %s4802_s14 = smul.u32 24, %s218_s25  ;;  %s4447_s23 = sshll.u32 %s5360_s22, 4 }
  0x18   : > { %v4858_v10 = vld [vmem:[%s6688_s0 + $0x2a4] ss:$16 sps:$4 sm:$0xff]   ;;  %v4861_v12 = vld [vmem:[%s6688_s0 + $0x2a0] ss:$16 sps:$4 sm:$0xff]   ;;  %v4902_v44 = vld [vmem:[%s6688_s0 + $0xcc] ss:$16 sps:$4 sm:$0xff]   ;;  %s4028_s8 = scalar_lea.hbm %s6693_s5, %s4447_s23 }
  0x19   : > { %849 = vmatpush1.bf16.msra.mxu0 %v4854_v7  ;;  %v4862_v13 = vld [vmem:[%s6688_s0 + $0x84] ss:$16 sps:$4 sm:$0xff]   ;;  %v4866_v15 = vld [vmem:[%s6688_s0 + $0x80] ss:$16 sps:$4 sm:$0xff]   ;;  %s5462_s25 = scalar_lea.vmem %s6692_s4, %s4802_s14  ;;  %v4900_v45 = vld [vmem:[%s6688_s0 + $0xc8] ss:$16 sps:$4 sm:$0xff]  }
  0x1a   : > { %902 = vmatpush1.bf16.msra.mxu1 %v4855_v8  ;;  %850 = vmatprep.subr.bf16.mxu0 %v4856_v9  ;;  %v4864_v14 = vld [vmem:[%s6688_s0 + $0x284] ss:$16 sps:$4 sm:$0xff]   ;;  %v4867_v16 = vld [vmem:[%s6688_s0 + $0x280] ss:$16 sps:$4 sm:$0xff]   ;;  %v5477_v28 = vld [vmem:[%s5462_s25 + $0x8] sm:$0xff]  ;;  %s5308_s22 = smov [#allocation2]  }
  0x1b   : > { %903 = vmatprep.subr.bf16.mxu1 %v4858_v10  ;;  %v4868_v17 = vld [vmem:[%s6688_s0 + $0x64] ss:$16 sps:$4 sm:$0xff]   ;;  %v4872_v19 = vld [vmem:[%s6688_s0 + $0x60] ss:$16 sps:$4 sm:$0xff]   ;;  %231 = vst [vmem:[#allocation4 + $0x8] sm:$0xff] %v5477_v28  ;;  %v4093_v57 = vld [vmem:[%s5462_s25 + $0x38] sm:$0xff] }
  0x1c   : > { %v4870_v18 = vld [vmem:[%s6688_s0 + $0x264] ss:$16 sps:$4 sm:$0xff]   ;;  %v4873_v20 = vld [vmem:[%s6688_s0 + $0x260] ss:$16 sps:$4 sm:$0xff]   ;;  %v4908_v48 = vld [vmem:[%s6688_s0 + $0xac] ss:$16 sps:$4 sm:$0xff]  }
  0x1d   : > { %851 = vmatpush1.bf16.msra.mxu0 %v4860_v11  ;;  %v4874_v21 = vld [vmem:[%s6688_s0 + $0x44] ss:$16 sps:$4 sm:$0xff]   ;;  %v4878_v23 = vld [vmem:[%s6688_s0 + $0x40] ss:$16 sps:$4 sm:$0xff]   ;;  %v4906_v49 = vld [vmem:[%s6688_s0 + $0xa8] ss:$16 sps:$4 sm:$0xff]  }
  0x1e   : > { %904 = vmatpush1.bf16.msra.mxu1 %v4861_v12  ;;  %852 = vmatprep.subr.bf16.mxu0 %v4862_v13  ;;  %v4876_v22 = vld [vmem:[%s6688_s0 + $0x244] ss:$16 sps:$4 sm:$0xff]   ;;  %v4879_v24 = vld [vmem:[%s6688_s0 + $0x240] ss:$16 sps:$4 sm:$0xff]   ;;  %v4914_v52 = vld [vmem:[%s6688_s0 + $0x8c] ss:$16 sps:$4 sm:$0xff]  }
  0x1f   : > { %905 = vmatprep.subr.bf16.mxu1 %v4864_v14  ;;  %v4880_v25 = vld [vmem:[%s6688_s0 + $0x24] ss:$16 sps:$4 sm:$0xff]   ;;  %v4884_v30 = vld [vmem:[%s6688_s0 + $0x20] ss:$16 sps:$4 sm:$0xff]   ;;  %v4912_v53 = vld [vmem:[%s6688_s0 + $0x88] ss:$16 sps:$4 sm:$0xff]  }
  0x20   : > { %v4882_v26 = vld [vmem:[%s6688_s0 + $0x224] ss:$16 sps:$4 sm:$0xff]   ;;  %v4885_v31 = vld [vmem:[%s6688_s0 + $0x220] ss:$16 sps:$4 sm:$0xff]   ;;  %v4920_v58 = vld [vmem:[%s6688_s0 + $0x6c] ss:$16 sps:$4 sm:$0xff]  }
  0x21   : > { %853 = vmatpush1.bf16.msra.mxu0 %v4866_v15  ;;  %v5474_v27 = vld [vmem:[%s5462_s25] sm:$0xff]  ;;  %v4091_v29 = vld [vmem:[%s5462_s25 + $0x10] sm:$0xff]  ;;  %249 = vst [vmem:[#allocation4 + $0x20] sm:$0xff] %v4093_v57  ;;  %v4918_v60 = vld [vmem:[%s6688_s0 + $0x68] ss:$16 sps:$4 sm:$0xff]   ;;  %s5248_s11 = sshll.u32 %s5308_s22, 4  ;;  %s5249_s11 = int_to_ptr.vmem [resolvable:$false] %s5248_s11 }
  0x22   : > { %906 = vmatpush1.bf16.msra.mxu1 %v4867_v16  ;;  %854 = vmatprep.subr.bf16.mxu0 %v4868_v17  ;;  %225 = vst [vmem:[#allocation4] sm:$0xff] %v5474_v27  ;;  %v4886_v32 = vld [vmem:[%s6688_s0 + $0x4] ss:$16 sps:$4 sm:$0xff]   ;;  %237 = vst [vmem:[#allocation4 + $0x10] sm:$0xff] %v4091_v29  ;;  %v4890_v34 = vld [vmem:[%s6688_s0] ss:$16 sps:$4 sm:$0xff]   ;;  %v5617_v17 = vpack.c.bf16 %v5477_v28, %v5474_v27 }
  0x23   : > { %907 = vmatprep.subr.bf16.mxu1 %v4870_v18  ;;  %v4888_v33 = vld [vmem:[%s6688_s0 + $0x204] ss:$16 sps:$4 sm:$0xff]   ;;  %v4891_v35 = vld [vmem:[%s6688_s0 + $0x200] ss:$16 sps:$4 sm:$0xff]   ;;  %v4926_v63 = vld [vmem:[%s6688_s0 + $0x4c] ss:$16 sps:$4 sm:$0xff]  }
  0x24   : > { %v4892_v36 = vld [vmem:[%s6688_s0 + $0x1e4] ss:$16 sps:$4 sm:$0xff]   ;;  %v4897_v42 = vld [vmem:[%s6688_s0 + $0x1e0] ss:$16 sps:$4 sm:$0xff]   ;;  %v4924_v1 = vld [vmem:[%s6688_s0 + $0x48] ss:$16 sps:$4 sm:$0xff]  }
  0x25   : > { %855 = vmatpush1.bf16.msra.mxu0 %v4872_v19  ;;  %v4898_v43 = vld [vmem:[%s6688_s0 + $0x1c4] ss:$16 sps:$4 sm:$0xff]   ;;  %v4903_v46 = vld [vmem:[%s6688_s0 + $0x1c0] ss:$16 sps:$4 sm:$0xff]   ;;  %v4932_v5 = vld [vmem:[%s6688_s0 + $0x2c] ss:$16 sps:$4 sm:$0xff]  }
  0x26   : > { %908 = vmatpush1.bf16.msra.mxu1 %v4873_v20  ;;  %856 = vmatprep.subr.bf16.mxu0 %v4874_v21  ;;  %v4904_v47 = vld [vmem:[%s6688_s0 + $0x1a4] ss:$16 sps:$4 sm:$0xff]   ;;  %v4909_v50 = vld [vmem:[%s6688_s0 + $0x1a0] ss:$16 sps:$4 sm:$0xff]   ;;  %v4930_v6 = vld [vmem:[%s6688_s0 + $0x28] ss:$16 sps:$4 sm:$0xff]  }
  0x27   : > { %909 = vmatprep.subr.bf16.mxu1 %v4876_v22  ;;  %v4910_v51 = vld [vmem:[%s6688_s0 + $0x184] ss:$16 sps:$4 sm:$0xff]   ;;  %v4915_v54 = vld [vmem:[%s6688_s0 + $0x180] ss:$16 sps:$4 sm:$0xff]   ;;  %v4938_v10 = vld [vmem:[%s6688_s0 + $0xc] ss:$16 sps:$4 sm:$0xff]  }
  0x28   : > { %v4916_v55 = vld [vmem:[%s6688_s0 + $0x164] ss:$16 sps:$4 sm:$0xff]   ;;  %v4921_v61 = vld [vmem:[%s6688_s0 + $0x160] ss:$16 sps:$4 sm:$0xff]   ;;  %v4936_v13 = vld [vmem:[%s6688_s0 + $0x8] ss:$16 sps:$4 sm:$0xff]  }
  0x29   : > { %857 = vmatpush1.bf16.msra.mxu0 %v4878_v23  ;;  %v262_v38 = vld [vmem:[#allocation4 + $0x1] sm:$0xff]  ;;  %v263_v39 = vld [vmem:[#allocation4 + $0x9] sm:$0xff]  ;;  %s5250_s12 = scalar_lea.vmem %s5249_s11, 32 }
  0x2a   : > { %910 = vmatpush1.bf16.msra.mxu1 %v4879_v24  ;;  %858 = vmatprep.subr.bf16.mxu0 %v4880_v25  ;;  %v5509_v41 = vpack.c.bf16 %v263_v39, %v262_v38  ;;  %v4092_v56 = vld [vmem:[%s5462_s25 + $0x30] sm:$0xff]  ;;  %v4094_v0 = vld [vmem:[%s5462_s25 + $0x40] sm:$0xff]  ;;  %v4942_v15 = vld [vmem:[%s6688_s0 + $0x1ec] ss:$16 sps:$4 sm:$0xff]   ;;  %s215_s25 = sand.u32 1, %s5296_s19  }
  0x2b   : > { %911 = vmatprep.subr.bf16.mxu1 %v4882_v26  ;;  %243 = vst [vmem:[#allocation4 + $0x18] sm:$0xff] %v4092_v56  ;;  %v5560_v59 = vpack.c.bf16 %v4093_v57, %v4092_v56  ;;  %v4922_v62 = vld [vmem:[%s6688_s0 + $0x144] ss:$16 sps:$4 sm:$0xff]   ;;  %255 = vst [vmem:[#allocation4 + $0x28] sm:$0xff] %v4094_v0  ;;  %v4927_v3 = vld [vmem:[%s6688_s0 + $0x140] ss:$16 sps:$4 sm:$0xff]  }
  0x2c   : > { %v4928_v4 = vld [vmem:[%s6688_s0 + $0x124] ss:$16 sps:$4 sm:$0xff]   ;;  %v4933_v7 = vld [vmem:[%s6688_s0 + $0x120] ss:$16 sps:$4 sm:$0xff]   ;;  %v4945_v16 = vld [vmem:[%s6688_s0 + $0x2ec] ss:$16 sps:$4 sm:$0xff]  }
  0x2d   : > { %859 = vmatpush1.bf16.msra.mxu0 %v4884_v30  ;;  %878 = vmatprep.mubr.bf16.mxu0 %v5560_v59  ;;  %v4934_v9 = vld [vmem:[%s6688_s0 + $0x104] ss:$16 sps:$4 sm:$0xff]   ;;  %v4939_v14 = vld [vmem:[%s6688_s0 + $0x100] ss:$16 sps:$4 sm:$0xff]   ;;  %v4940_v18 = vld [vmem:[%s6688_s0 + $0x1e8] ss:$16 sps:$4 sm:$0xff]  }
  0x2e   : > { %912 = vmatpush1.bf16.msra.mxu1 %v4885_v31  ;;  %860 = vmatprep.subr.bf16.mxu0 %v4886_v32  ;;  %v4943_v19 = vld [vmem:[%s6688_s0 + $0x2e8] ss:$16 sps:$4 sm:$0xff]   ;;  %v4948_v20 = vld [vmem:[%s6688_s0 + $0x1cc] ss:$16 sps:$4 sm:$0xff]   ;;  %s216_s26 = scalar_lea.vmem [#allocation2], %s215_s25  ;;  %s4018_s9 = scalar_lea.sflag [#allocation3], %s215_s25 }
  0x2f   : > { %913 = vmatprep.subr.bf16.mxu1 %v4888_v33  ;;  %v4951_v21 = vld [vmem:[%s6688_s0 + $0x2cc] ss:$16 sps:$4 sm:$0xff]   ;;  %v4946_v22 = vld [vmem:[%s6688_s0 + $0x1c8] ss:$16 sps:$4 sm:$0xff]   ;;  %s4030_s30 = sshll.u32 %s216_s26, 4  ;;  %s4031_s30 = int_to_ptr.vmem [resolvable:$true] %s4030_s30 }
  0x30   : > { %v4949_v23 = vld [vmem:[%s6688_s0 + $0x2c8] ss:$16 sps:$4 sm:$0xff]   ;;  %v4954_v24 = vld [vmem:[%s6688_s0 + $0x1ac] ss:$16 sps:$4 sm:$0xff]   ;;  %s5244_s10 = scalar_lea.vmem %s4031_s30, 16  ;;  %p5251_p0 = scmp.lt.s32.totalorder %s4031_s30, %s5249_s11 }
  0x31   : > { %861 = vmatpush1.bf16.msra.mxu0 %v4890_v34  ;;  %v4957_v25 = vld [vmem:[%s6688_s0 + $0x2ac] ss:$16 sps:$4 sm:$0xff]   ;;  %v4952_v26 = vld [vmem:[%s6688_s0 + $0x1a8] ss:$16 sps:$4 sm:$0xff]   ;;  %p5245_p11 = scmp.ne.s32.totalorder %s4031_s30, %s5244_s10  ;;  %p5252_p1 = scmp.lt.s32.totalorder %s5250_s12, %s5244_s10 }
  0x32   : > { %914 = vmatpush1.bf16.msra.mxu1 %v4891_v35  ;;  %862 = vmatprep.subr.bf16.mxu0 %v4892_v36  ;;  %v264_v8 = vld [vmem:[#allocation4 + $0x19] sm:$0xff]  ;;  %v265_v11 = vld [vmem:[#allocation4 + $0x21] sm:$0xff] }
  0x33   : > { %952 = vmatprep.subr.bf16.mxu1 %v4896_v37  ;;  %v5600_v12 = vpack.c.bf16 %v265_v11, %v264_v8  ;;  %v4955_v27 = vld [vmem:[%s6688_s0 + $0x2a8] ss:$16 sps:$4 sm:$0xff]   ;;  %v4960_v28 = vld [vmem:[%s6688_s0 + $0x18c] ss:$16 sps:$4 sm:$0xff]   ;;  %p5246_p12 = pnand %p5245_p11, %p5377_p5  ;;  %p5253_p2 = por %p5252_p1, %p5251_p0 }
  0x34   : > { %v4963_v29 = vld [vmem:[%s6688_s0 + $0x28c] ss:$16 sps:$4 sm:$0xff]   ;;  %v4958_v30 = vld [vmem:[%s6688_s0 + $0x188] ss:$16 sps:$4 sm:$0xff]  }
  0x35   : > { %932 = vmatmul.mubr.bf16.vlgmr.msra.gmra.mxu1 %v5509_v41  ;;  %863 = vmatpush2.bf16.msra.mxu0 %v4897_v42  ;;  %v4961_v31 = vld [vmem:[%s6688_s0 + $0x288] ss:$16 sps:$4 sm:$0xff]   ;;  %v4966_v32 = vld [vmem:[%s6688_s0 + $0x16c] ss:$16 sps:$4 sm:$0xff]   ;;  %p5247_p13 = pneg %p5246_p12 }
  0x36   : > { %953 = vmatpush1.bf16.msra.mxu1 %v4894_v40  ;;  %864 = vmatprep.subr.bf16.mxu0 %v4898_v43  ;;  %v4969_v33 = vld [vmem:[%s6688_s0 + $0x26c] ss:$16 sps:$4 sm:$0xff]   ;;  %v4964_v34 = vld [vmem:[%s6688_s0 + $0x168] ss:$16 sps:$4 sm:$0xff]  }
  0x37   : > { %954 = vmatprep.subr.bf16.mxu1 %v4902_v44  ;;  %941 = vmatprep.mubr.bf16.mxu1 %v5306_v2  ;;  %v4967_v35 = vld [vmem:[%s6688_s0 + $0x268] ss:$16 sps:$4 sm:$0xff]   ;;  %v4972_v36 = vld [vmem:[%s6688_s0 + $0x14c] ss:$16 sps:$4 sm:$0xff]   ;;  %p5254_p3 = pnand %p5253_p2, %p5247_p13 }
  0x38   : > { %v4975_v37 = vld [vmem:[%s6688_s0 + $0x24c] ss:$16 sps:$4 sm:$0xff]   ;;  %v4970_v38 = vld [vmem:[%s6688_s0 + $0x148] ss:$16 sps:$4 sm:$0xff]  }
  0x39   : > { %865 = vmatpush2.bf16.msra.mxu0 %v4903_v46  ;;  %v4973_v39 = vld [vmem:[%s6688_s0 + $0x248] ss:$16 sps:$4 sm:$0xff]   ;;  %v4978_v40 = vld [vmem:[%s6688_s0 + $0x12c] ss:$16 sps:$4 sm:$0xff]  }
  0x3a   : > { %955 = vmatpush1.bf16.msra.mxu1 %v4900_v45  ;;  %866 = vmatprep.subr.bf16.mxu0 %v4904_v47  ;;  %v4981_v42 = vld [vmem:[%s6688_s0 + $0x22c] ss:$16 sps:$4 sm:$0xff]   ;;  %v4976_v43 = vld [vmem:[%s6688_s0 + $0x128] ss:$16 sps:$4 sm:$0xff]  }
  0x3b   : > { %956 = vmatprep.subr.bf16.mxu1 %v4908_v48  ;;  %v4979_v44 = vld [vmem:[%s6688_s0 + $0x228] ss:$16 sps:$4 sm:$0xff]   ;;  %v4984_v45 = vld [vmem:[%s6688_s0 + $0x10c] ss:$16 sps:$4 sm:$0xff]  }
  0x3c   : > { %v4987_v46 = vld [vmem:[%s6688_s0 + $0x20c] ss:$16 sps:$4 sm:$0xff]   ;;  %v4982_v47 = vld [vmem:[%s6688_s0 + $0x108] ss:$16 sps:$4 sm:$0xff]  }
  0x3d   : > { %867 = vmatpush2.bf16.msra.mxu0 %v4909_v50  ;;  %942 = vmatmul.mubr.bf16.gmra.mxu1 %v5600_v12  ;;  %v4985_v48 = vld [vmem:[%s6688_s0 + $0x208] ss:$16 sps:$4 sm:$0xff]  }
  0x3e   : > { %957 = vmatpush1.bf16.msra.mxu1 %v4906_v49  ;;  %868 = vmatprep.subr.bf16.mxu0 %v4910_v51  ;;  %v4988_v49 = vld [vmem:[%s6690_s2 + $0x78] sm:$0xff]   ;;  %v4997_v56 = vld [vmem:[%s6690_s2 + $0xe8] sm:$0xff]  }
  0x3f   : > { %958 = vmatprep.subr.bf16.mxu1 %v4914_v52  ;;  %984 = vmatprep.mubr.bf16.mxu1 %v5560_v59  ;;  %v4989_v50 = vld [vmem:[%s6690_s2 + $0xf8] sm:$0xff]   ;;  %v4993_v52 = vld [vmem:[%s6690_s2 + $0xf0] sm:$0xff]   ;;  %v4998_v57 = vld [vmem:[%s6690_s2 + $0x28] sm:$0xff]  }
  0x40   : > { %v4990_v51 = vld [vmem:[%s6690_s2 + $0x38] sm:$0xff]   ;;  %v5012_v8 = vld [vmem:[%s6690_s2 + $0x48] sm:$0xff]  }
  0x41   : > { %869 = vmatpush2.bf16.msra.mxu0 %v4915_v54  ;;  %v4995_v54 = vld [vmem:[%s6690_s2 + $0xb0] sm:$0xff]   ;;  %v5005_v0 = vld [vmem:[%s6690_s2 + $0xd8] sm:$0xff]   ;;  %v5015_v11 = vld [vmem:[%s6690_s2 + $0x88] sm:$0xff]  }
  0x42   : > { %959 = vmatpush1.bf16.msra.mxu1 %v4912_v53  ;;  %870 = vmatprep.subr.bf16.mxu0 %v4916_v55  ;;  %v4994_v53 = vld [vmem:[%s6690_s2 + $0x30] sm:$0xff]   ;;  %v4996_v55 = vld [vmem:[%s6690_s2 + $0x68] sm:$0xff]  }
  0x43   : > { %960 = vmatprep.subr.bf16.mxu1 %v4920_v58  ;;  %v4999_v58 = vld [vmem:[%s6690_s2 + $0xa8] sm:$0xff]  }
  0x45   : > { %871 = vmatpush2.bf16.msra.mxu0 %v4921_v61  ;;  %v5002_v61 = vld [vmem:[%s6690_s2 + $0x20] sm:$0xff]  }
  0x46   : > { %961 = vmatpush1.bf16.msra.mxu1 %v4918_v60  ;;  %872 = vmatprep.subr.bf16.mxu0 %v4922_v62  ;;  %v5001_v60 = vld [vmem:[%s6690_s2 + $0xe0] sm:$0xff]  }
  0x47   : > { %962 = vmatprep.subr.bf16.mxu1 %v4926_v63  ;;  %v5003_v62 = vld [vmem:[%s6690_s2 + $0xa0] sm:$0xff]   ;;  %v5004_v63 = vld [vmem:[%s6690_s2 + $0x58] sm:$0xff]  }
  0x49   : > { %873 = vmatpush2.bf16.msra.mxu0 %v4927_v3  ;;  %v5007_v3 = vld [vmem:[%s6690_s2 + $0x98] sm:$0xff]  }
  0x4a   : > { %963 = vmatpush1.bf16.msra.mxu1 %v4924_v1  ;;  %874 = vmatprep.subr.bf16.mxu0 %v4928_v4  ;;  %v5006_v1 = vld [vmem:[%s6690_s2 + $0x18] sm:$0xff]   ;;  %v5008_v4 = vld [vmem:[%s6690_s2 + $0x50] sm:$0xff]  }
  0x4b   : > { %964 = vmatprep.subr.bf16.mxu1 %v4932_v5  ;;  %v5009_v5 = vld [vmem:[%s6690_s2 + $0xd0] sm:$0xff]  }
  0x4d   : > { %875 = vmatpush2.bf16.msra.mxu0 %v4933_v7  ;;  %v5011_v7 = vld [vmem:[%s6690_s2 + $0x90] sm:$0xff]  }
  0x4e   : > { %965 = vmatpush1.bf16.msra.mxu1 %v4930_v6  ;;  %876 = vmatprep.subr.bf16.mxu0 %v4934_v9  ;;  %v5010_v6 = vld [vmem:[%s6690_s2 + $0x10] sm:$0xff]   ;;  %v5013_v9 = vld [vmem:[%s6690_s2 + $0xc8] sm:$0xff]  }
  0x4f   : > { %966 = vmatprep.subr.bf16.mxu1 %v4938_v10  ;;  %v5014_v10 = vld [vmem:[%s6690_s2 + $0x8] sm:$0xff]  }
  0x51   : > { %877 = vmatpush2.bf16.msra.mxu0 %v4939_v14  ;;  %v5018_v14 = vld [vmem:[%s6690_s2] sm:$0xff]  }
  0x52   : > { %967 = vmatpush1.bf16.msra.mxu1 %v4936_v13  ;;  %1005 = vmatprep.subr.bf16.mxu0 %v4945_v16  ;;  %v5017_v13 = vld [vmem:[%s6690_s2 + $0xc0] sm:$0xff]   ;;  %v5020_v16 = vld [vmem:[%s6690_s2 + $0x178] sm:$0xff]  }
  0x53   : > { %968 = vmatprep.subr.bf16.mxu1 %v4942_v15  ;;  %v5019_v15 = vld [vmem:[%s6690_s2 + $0x80] sm:$0xff]  }
  0x54   : > { %879 = vmatmul.mubr.bf16.vlgmr.msra.gmra.mxu0 %v5617_v17 }
  0x55   : > { %1006 = vmatpush1.bf16.msra.mxu0 %v4943_v19  ;;  %888 = vmatprep.mubr.bf16.mxu0 %v5509_v41 }
  0x56   : > { %969 = vmatpush2.bf16.msra.mxu1 %v4940_v18  ;;  %1007 = vmatprep.subr.bf16.mxu0 %v4951_v21 }
  0x57   : > { %970 = vmatprep.subr.bf16.mxu1 %v4948_v20 }
  0x59   : > { %1008 = vmatpush1.bf16.msra.mxu0 %v4949_v23 }
  0x5a   : > { %971 = vmatpush2.bf16.msra.mxu1 %v4946_v22  ;;  %1009 = vmatprep.subr.bf16.mxu0 %v4957_v25 }
  0x5b   : > { %972 = vmatprep.subr.bf16.mxu1 %v4954_v24 }
  0x5c   : > { %889 = vmatmul.mubr.bf16.gmra.mxu0 %v5560_v59 }
  0x5d   : > { %1010 = vmatpush1.bf16.msra.mxu0 %v4955_v27  ;;  %1037 = vmatprep.mubr.bf16.mxu0 %v5306_v2 }
  0x5e   : > { %973 = vmatpush2.bf16.msra.mxu1 %v4952_v26  ;;  %1011 = vmatprep.subr.bf16.mxu0 %v4963_v29 }
  0x5f   : > { %974 = vmatprep.subr.bf16.mxu1 %v4960_v28 }
  0x61   : > { %1012 = vmatpush1.bf16.msra.mxu0 %v4961_v31 }
  0x62   : > { %975 = vmatpush2.bf16.msra.mxu1 %v4958_v30  ;;  %1013 = vmatprep.subr.bf16.mxu0 %v4969_v33 }
  0x63   : > { %976 = vmatprep.subr.bf16.mxu1 %v4966_v32 }
  0x65   : > { %1014 = vmatpush1.bf16.msra.mxu0 %v4967_v35 }
  0x66   : > { %977 = vmatpush2.bf16.msra.mxu1 %v4964_v34  ;;  %1015 = vmatprep.subr.bf16.mxu0 %v4975_v37 }
  0x67   : > { %978 = vmatprep.subr.bf16.mxu1 %v4972_v36 }
  0x69   : > { %1016 = vmatpush1.bf16.msra.mxu0 %v4973_v39 }
  0x6a   : > { %979 = vmatpush2.bf16.msra.mxu1 %v4970_v38  ;;  %1017 = vmatprep.subr.bf16.mxu0 %v4981_v42 }
  0x6b   : > { %980 = vmatprep.subr.bf16.mxu1 %v4978_v40  ;;  %v1072_v40 = vlaneseq }
  0x6d   : > { %1018 = vmatpush1.bf16.msra.mxu0 %v4979_v44 }
  0x6e   : > { %981 = vmatpush2.bf16.msra.mxu1 %v4976_v43  ;;  %1019 = vmatprep.subr.bf16.mxu0 %v4987_v46  ;;  %v5825_v46 = vshrl.u32 %v1072_v40, 7 }
  0x6f   : > { %982 = vmatprep.subr.bf16.mxu1 %v4984_v45 }
  0x71   : > { %1020 = vmatpush1.bf16.msra.mxu0 %v4985_v48 }
  0x72   : > { %983 = vmatpush2.bf16.msra.mxu1 %v4982_v47  ;;  %4450 = vmatprep.subr.bf16.mxu0 %v4988_v49 }
  0x73   : > { %4472 = vmatprep.subr.bf16.mxu1 %v4989_v50 }
  0x74   : > { %1038 = vmatmul.mubr.bf16.vlgmr.msra.gmra.mxu0 %v5509_v41 }
  0x75   : > { %985 = vmatmul.mubr.bf16.vlgmr.msra.gmra.mxu1 %v5617_v17  ;;  %1047 = vmatprep.mubr.bf16.mxu0 %v5306_v2  ;;  %v4991_v2 = vld [vmem:[%s6690_s2 + $0xb8] sm:$0xff]  }
  0x76   : > { %994 = vmatprep.mubr.bf16.mxu1 %v5509_v41  ;;  %4451 = vmatpush3.bf16.msra.mxu0 %v4990_v51  ;;  %v4992_v41 = vld [vmem:[%s6690_s2 + $0x70] sm:$0xff]   ;;  %v5021_v17 = vld [vmem:[%s6690_s2 + $0x1f8] sm:$0xff]  }
  0x77   : > { %4473 = vmatpush3.bf16.msra.mxu1 %v4991_v2  ;;  %4452 = vmatprep.subr.bf16.mxu0 %v4992_v41  ;;  %v5828_v2 = vsub.s32 0, %v5825_v46 }
  0x78   : > { %4474 = vmatprep.subr.bf16.mxu1 %v4993_v52 }
  0x7a   : > { %4453 = vmatpush3.bf16.msra.mxu0 %v4994_v53  ;;  %v1070_v53 = vld [vmem:[%s6689_s1] sm:$0x3] }
  0x7b   : > { %4475 = vmatpush3.bf16.msra.mxu1 %v4995_v54  ;;  %4454 = vmatprep.subr.bf16.mxu0 %v4996_v55 }
  0x7c   : > { %1048 = vmatmul.mubr.bf16.gmra.mxu0 %v5600_v12  ;;  %4476 = vmatprep.subr.bf16.mxu1 %v4997_v56  ;;  %v5016_v12 = vld [vmem:[%s6690_s2 + $0x40] sm:$0xff]   ;;  %v5834_v56 = vsub.s32 1, %v5825_v46 }
  0x7d   : > { %995 = vmatmul.mubr.bf16.gmra.mxu1 %v5560_v59  ;;  %v5000_v59 = vld [vmem:[%s6690_s2 + $0x60] sm:$0xff]  }
  0x7e   : > { %4455 = vmatpush3.bf16.msra.mxu0 %v4998_v57 }
  0x7f   : > { %4477 = vmatpush3.bf16.msra.mxu1 %v4999_v58  ;;  %4456 = vmatprep.subr.bf16.mxu0 %v5000_v59 }
  0x80   : > { %4478 = vmatprep.subr.bf16.mxu1 %v5001_v60 }
  0x82   : > { %4457 = vmatpush3.bf16.msra.mxu0 %v5002_v61 }
  0x83   : > { %4479 = vmatpush3.bf16.msra.mxu1 %v5003_v62  ;;  %4458 = vmatprep.subr.bf16.mxu0 %v5004_v63  ;;  %v1075_v62 = vrot.slane %v1070_v53, %v5828_v2 }
  0x84   : > { %4480 = vmatprep.subr.bf16.mxu1 %v5005_v0 }
  0x86   : > { %4459 = vmatpush3.bf16.msra.mxu0 %v5006_v1  ;;  %v5307_v1 = vmov 1935823168  }
  0x87   : > { %4481 = vmatpush3.bf16.msra.mxu1 %v5007_v3  ;;  %4460 = vmatprep.subr.bf16.mxu0 %v5008_v4  ;;  %v1103_v3 = vunpack.c.l.s4 %v5307_v1  ;;  %v5026_v1 = vld [vmem:[%s6690_s2 + $0x130] sm:$0xff]  }
  0x88   : > { %4482 = vmatprep.subr.bf16.mxu1 %v5009_v5 }
  0x8a   : > { %4461 = vmatpush3.bf16.msra.mxu0 %v5010_v6 }
  0x8b   : > { %4483 = vmatpush3.bf16.msra.mxu1 %v5011_v7  ;;  %4462 = vmatprep.subr.bf16.mxu0 %v5012_v8  ;;  %v1079_v8 = vrot.slane %v1070_v53, %v5834_v56  ;;  %v5022_v53 = vld [vmem:[%s6690_s2 + $0x138] sm:$0xff]  }
  0x8c   : > { %4484 = vmatprep.subr.bf16.mxu1 %v5013_v9 }
  0x8e   : > { %4463 = vmatpush3.bf16.msra.mxu0 %v5014_v10 }
  0x8f   : > { %4485 = vmatpush3.bf16.msra.mxu1 %v5015_v11  ;;  %4464 = vmatprep.subr.bf16.mxu0 %v5016_v12 }
  0x90   : > { %4486 = vmatprep.subr.bf16.mxu1 %v5017_v13 }
  0x92   : > { %4465 = vmatpush3.bf16.msra.mxu0 %v5018_v14 }
  0x93   : > { %4487 = vmatpush3.bf16.msra.mxu1 %v5019_v15  ;;  %4494 = vmatprep.subr.bf16.mxu0 %v5020_v16  ;;  %v1104_v15 = vunpack.c.0.s8 %v1103_v3  ;;  %v5027_v3 = vld [vmem:[%s6690_s2 + $0x1b0] sm:$0xff]  }
  0x94   : > { %4516 = vmatprep.subr.bf16.mxu1 %v5021_v17 }
  0xf5   : > { %v933_v18 = vpop.f32.mrf.mxu1 }
  0xf7   : > { %v935_v19 = vpop.f32.mrf.mxu1 }
  0xf9   : > { %v937_v20 = vpop.f32.mrf.mxu1 }
  0xfb   : > { %v939_v21 = vpop.f32.mrf.mxu1 }
  0xfd   : > { %v943_v23 = vpop.f32.mrf.mxu1 }
  0xff   : > { %v945_v26 = vpop.f32.mrf.mxu1 }
 0x101   : > { %v947_v31 = vpop.f32.mrf.mxu1 }
 0x103   : > { %v949_v34 = vpop.f32.mrf.mxu1 }
 0x114   : > { %v880_v22 = vpop.f32.mrf.mxu0 }
 0x115   : > { %v934_v57 = vadd.f32 %v933_v18, %v880_v22 }
 0x116   : > { %v882_v24 = vpop.f32.mrf.mxu0 }
 0x117   : > { %v936_v61 = vadd.f32 %v935_v19, %v882_v24 }
 0x118   : > { %v884_v25 = vpop.f32.mrf.mxu0 }
 0x119   : > { %v938_v27 = vadd.f32 %v937_v20, %v884_v25  ;;  %v1107_v25 = vsub.s32 %v1104_v15, %v5825_v46 }
 0x11a   : > { %v886_v28 = vpop.f32.mrf.mxu0 }
 0x11b   : > { %v5822_v29 = vadd.f32 %v939_v21, %v886_v28 }
 0x11c   : > { %v890_v30 = vpop.f32.mrf.mxu0 }
 0x11d   : > { %v944_v41 = vadd.f32 %v943_v23, %v890_v30 }
 0x11e   : > { %v892_v32 = vpop.f32.mrf.mxu0 }
 0x11f   : > { %v946_v58 = vadd.f32 %v945_v26, %v892_v32  ;;  %v1058_v4 = vmax.f32 %v934_v57, %v944_v41  ;;  %v5840_v32 = vsub.s32 3, %v5825_v46 }
 0x120   : > { %v894_v33 = vpop.f32.mrf.mxu0 }
 0x121   : > { %v948_v35 = vadd.f32 %v947_v31, %v894_v33  ;;  %v1059_v11 = vmax.f32 %v936_v61, %v946_v58  ;;  %v5843_v33 = vsub.s32 2, %v5825_v46  ;;  %v5884_v61 = vsub.s32 4, %v5825_v46 }
 0x122   : > { %v896_v36 = vpop.f32.mrf.mxu0 }
 0x123   : > { %v1062_v37 = vmax.f32 %v938_v27, %v948_v35  ;;  %v950_v38 = vadd.f32 %v949_v34, %v896_v36  ;;  %v5846_v34 = vsub.s32 5, %v5825_v46  ;;  %v5849_v35 = vsub.s32 7, %v5825_v46 }
 0x125   : > { %v1063_v39 = vmax.f32 %v5822_v29, %v950_v38 }
 0x134   : > { %v1039_v43 = vpop.f32.mrf.mxu0 }
 0x135   : > { %v986_v42 = vpop.f32.mrf.mxu1 }
 0x136   : > { %v1041_v45 = vpop.f32.mrf.mxu0  ;;  %v1040_v59 = vadd.f32 %v1039_v43, %v986_v42 }
 0x137   : > { %v988_v44 = vpop.f32.mrf.mxu1 }
 0x138   : > { %v1043_v48 = vpop.f32.mrf.mxu0  ;;  %v1042_v5 = vadd.f32 %v1041_v45, %v988_v44 }
 0x139   : > { %v990_v47 = vpop.f32.mrf.mxu1 }
 0x13a   : > { %v1044_v49 = vadd.f32 %v1043_v48, %v990_v47  ;;  %v1045_v51 = vpop.f32.mrf.mxu0 }
 0x13b   : > { %v992_v50 = vpop.f32.mrf.mxu1 }
 0x13c   : > { %v1046_v52 = vadd.f32 %v1045_v51, %v992_v50  ;;  %v1049_v55 = vpop.f32.mrf.mxu0 }
 0x13d   : > { %v996_v54 = vpop.f32.mrf.mxu1 }
 0x13e   : > { %v1050_v60 = vadd.f32 %v1049_v55, %v996_v54  ;;  %v1051_v0 = vpop.f32.mrf.mxu0  ;;  %v5023_v54 = vld [vmem:[%s6690_s2 + $0x1b8] sm:$0xff]  }
 0x13f   : > { %v998_v63 = vpop.f32.mrf.mxu1 }
 0x140   : > { %v1060_v6 = vmax.f32 %v1040_v59, %v1050_v60  ;;  %v1052_v7 = vadd.f32 %v1051_v0, %v998_v63  ;;  %v1053_v10 = vpop.f32.mrf.mxu0  ;;  %v5024_v59 = vld [vmem:[%s6690_s2 + $0x170] sm:$0xff]   ;;  %v5887_v0 = vsub.s32 6, %v5825_v46  ;;  %v5029_v46 = vld [vmem:[%s6690_s2 + $0x1e8] sm:$0xff]  }
 0x141   : > { %v1000_v9 = vpop.f32.mrf.mxu1  ;;  %v5025_v60 = vld [vmem:[%s6690_s2 + $0x1f0] sm:$0xff]  }
 0x142   : > { %v1066_v12 = vmax.f32 %v1058_v4, %v1060_v6  ;;  %v1061_v13 = vmax.f32 %v1042_v5, %v1052_v7  ;;  %v1054_v14 = vadd.f32 %v1053_v10, %v1000_v9  ;;  %v1055_v17 = vpop.f32.mrf.mxu0  ;;  %v5028_v4 = vld [vmem:[%s6690_s2 + $0x168] sm:$0xff]   ;;  %v5032_v10 = vld [vmem:[%s6690_s2 + $0x160] sm:$0xff]  }
 0x143   : > { %v1002_v16 = vpop.f32.mrf.mxu1  ;;  %v5031_v9 = vld [vmem:[%s6690_s2 + $0x1a8] sm:$0xff]  }
 0x144   : > { %v1082_v18 = vadd.f32 %v1075_v62, %v1066_v12  ;;  %v1067_v19 = vmax.f32 %v1059_v11, %v1061_v13  ;;  %v1064_v20 = vmax.f32 %v1044_v49, %v1054_v14  ;;  %v1056_v21 = vadd.f32 %v1055_v17, %v1002_v16  ;;  %v5033_v11 = vld [vmem:[%s6690_s2 + $0x1e0] sm:$0xff]  }
 0x146   : > { %v1083_v22 = vadd.f32 %v1079_v8, %v1067_v19  ;;  %v1068_v23 = vmax.f32 %v1062_v37, %v1064_v20  ;;  %v1065_v24 = vmax.f32 %v1046_v52, %v1056_v21  ;;  %v1086_v26 = vmax.f32 %v1082_v18, 0.0  ;;  %v5034_v18 = vld [vmem:[%s6690_s2 + $0x120] sm:$0xff]   ;;  %v5036_v20 = vld [vmem:[%s6690_s2 + $0x158] sm:$0xff]  }
 0x147   : > { %v5035_v19 = vld [vmem:[%s6690_s2 + $0x1a0] sm:$0xff]   ;;  %v5037_v21 = vld [vmem:[%s6690_s2 + $0x1d8] sm:$0xff]  }
 0x148   : > { %v1087_v27 = vmax.f32 %v1083_v22, 0.0  ;;  %v1084_v28 = vadd.f32 %v1075_v62, %v1068_v23  ;;  %v1069_v29 = vmax.f32 %v1063_v39, %v1065_v24 }
 0x14a   : > { %v1094_v30 = vcombine.low %v1086_v26, %v1087_v27  ;;  %v1085_v31 = vadd.f32 %v1079_v8, %v1069_v29  ;;  %v1088_v37 = vmax.f32 %v1084_v28, 0.0  ;;  %v1095_v40 = vcombine.high %v1086_v26, %v1087_v27  ;;  %v5030_v8 = vld [vmem:[%s6690_s2 + $0x128] sm:$0xff]   ;;  %v5038_v27 = vld [vmem:[%s6690_s2 + $0x118] sm:$0xff]   ;;  %v5040_v29 = vld [vmem:[%s6690_s2 + $0x150] sm:$0xff]  }
 0x14b   : > { %v5039_v28 = vld [vmem:[%s6690_s2 + $0x198] sm:$0xff]  }
 0x14c   : > { %v5851_v36 = vrot.slane %v1094_v30, %v1107_v25  ;;  %v1089_v38 = vmax.f32 %v1085_v31, 0.0  ;;  %v5875_v58 = vrot.slane %v1095_v40, %v1107_v25  ;;  %v5041_v30 = vld [vmem:[%s6690_s2 + $0x1d0] sm:$0xff]   ;;  %v5045_v40 = vld [vmem:[%s6690_s2 + $0x1c8] sm:$0xff]  }
 0x14d   : > { %v5042_v31 = vld [vmem:[%s6690_s2 + $0x110] sm:$0xff]  }
 0x14e   : > { %v1096_v39 = vcombine.low %v1088_v37, %v1089_v38  ;;  %v1097_v42 = vcombine.high %v1088_v37, %v1089_v38  ;;  %v1141_v43 = vrot.slane %v5851_v36, %v5834_v56  ;;  %v1149_v44 = vrot.slane %v5851_v36, %v5840_v32  ;;  %v5043_v37 = vld [vmem:[%s6690_s2 + $0x190] sm:$0xff]   ;;  %v5044_v38 = vld [vmem:[%s6690_s2 + $0x148] sm:$0xff]  }
 0x14f   : > { %v1137_v45 = vrot.slane %v5851_v36, %v5828_v2  ;;  %v1145_v47 = vrot.slane %v5851_v36, %v5843_v33  ;;  %v1157_v48 = vrot.slane %v5851_v36, %v5846_v34  ;;  %v1165_v49 = vrot.slane %v5851_v36, %v5849_v35 }
 0x150   : > { %v5865_v50 = vrot.slane %v1096_v39, %v1107_v25  ;;  %v5867_v51 = vrot.slane %v1097_v42, %v1107_v25  ;;  %v1295_v41 = vpack.c.bf16 %v1141_v43, %v1141_v43  ;;  %v1297_v52 = vpack.c.bf16 %v1149_v44, %v1149_v44  ;;  %v5046_v39 = vld [vmem:[%s6690_s2 + $0x108] sm:$0xff]   ;;  %v5048_v43 = vld [vmem:[%s6690_s2 + $0x140] sm:$0xff]  }
 0x151   : > { %v1294_v55 = vpack.c.bf16 %v1137_v45, %v1137_v45  ;;  %v1296_v57 = vpack.c.bf16 %v1145_v47, %v1145_v47  ;;  %v1299_v62 = vpack.c.bf16 %v1157_v48, %v1157_v48  ;;  %v1301_v63 = vpack.c.bf16 %v1165_v49, %v1165_v49  ;;  %v5047_v42 = vld [vmem:[%s6690_s2 + $0x188] sm:$0xff]   ;;  %v5049_v44 = vld [vmem:[%s6690_s2 + $0x1c0] sm:$0xff]  }
 0x152   : > { %3407 = vmatprep.mubr.bf16.mxu0 %v1295_v41  ;;  %3447 = vmatprep.mubr.bf16.mxu1 %v1297_v52  ;;  %v5903_v5 = vrot.slane %v5875_v58, %v5884_v61  ;;  %v5907_v6 = vrot.slane %v5875_v58, %v5887_v0  ;;  %v5911_v7 = vrot.slane %v5865_v50, %v5840_v32  ;;  %v5050_v45 = vld [vmem:[%s6690_s2 + $0x100] sm:$0xff]   ;;  %v5052_v41 = vld [vmem:[%s6690_s2 + $0x278] sm:$0xff]  }
 0x153   : > { %3408 = vmatmul.mubr.bf16.vlgmr.msra.gmra.mxu0 %v1294_v55  ;;  %3448 = vmatmul.mubr.bf16.vlgmr.msra.gmra.mxu1 %v1296_v57  ;;  %v5927_v12 = vrot.slane %v5865_v50, %v5843_v33  ;;  %v5931_v13 = vrot.slane %v5865_v50, %v5846_v34  ;;  %v5935_v14 = vrot.slane %v5865_v50, %v5849_v35  ;;  %v5051_v47 = vld [vmem:[%s6690_s2 + $0x180] sm:$0xff]   ;;  %v5053_v52 = vld [vmem:[%s6690_s2 + $0x2f8] sm:$0xff]  }
 0x154   : > { %4495 = vmatpush3.bf16.msra.mxu0 %v5022_v53  ;;  %4517 = vmatpush3.bf16.msra.mxu1 %v5023_v54  ;;  %v5939_v15 = vrot.slane %v5865_v50, %v5884_v61  ;;  %v5943_v16 = vrot.slane %v5865_v50, %v5887_v0  ;;  %v5947_v17 = vrot.slane %v5867_v51, %v5840_v32 }
 0x155   : > { %3487 = vmatprep.mubr.bf16.mxu0 %v1299_v62  ;;  %3527 = vmatprep.mubr.bf16.mxu1 %v1301_v63  ;;  %v5963_v22 = vrot.slane %v5867_v51, %v5843_v33  ;;  %v5967_v23 = vrot.slane %v5867_v51, %v5846_v34  ;;  %v5971_v24 = vrot.slane %v5867_v51, %v5849_v35  ;;  %v5058_v63 = vld [vmem:[%s6690_s2 + $0x230] sm:$0xff]  }
 0x156   : > { %4496 = vmatprep.subr.bf16.mxu0 %v5024_v59  ;;  %4518 = vmatprep.subr.bf16.mxu1 %v5025_v60  ;;  %v5975_v25 = vrot.slane %v5867_v51, %v5884_v61  ;;  %v5979_v26 = vrot.slane %v5867_v51, %v5887_v0  ;;  %v1153_v48 = vrot.slane %v5851_v36, %v5884_v61  ;;  %v5055_v59 = vld [vmem:[%s6690_s2 + $0x2b8] sm:$0xff]   ;;  %v5056_v61 = vld [vmem:[%s6690_s2 + $0x270] sm:$0xff]  }
 0x157   : > { %v1161_v49 = vrot.slane %v5851_v36, %v5887_v0  ;;  %v1173_v53 = vrot.slane %v5875_v58, %v5834_v56  ;;  %v1181_v54 = vrot.slane %v5875_v58, %v5840_v32  ;;  %v5054_v36 = vld [vmem:[%s6690_s2 + $0x238] sm:$0xff]   ;;  %v5057_v32 = vld [vmem:[%s6690_s2 + $0x2f0] sm:$0xff]  }
 0x158   : > { %4497 = vmatpush3.bf16.msra.mxu0 %v5026_v1  ;;  %4519 = vmatpush3.bf16.msra.mxu1 %v5027_v3  ;;  %v1298_v55 = vpack.c.bf16 %v1153_v48, %v1153_v48  ;;  %v5059_v0 = vld [vmem:[%s6690_s2 + $0x2b0] sm:$0xff]   ;;  %v5060_v1 = vld [vmem:[%s6690_s2 + $0x268] sm:$0xff]   ;;  %v1177_v48 = vrot.slane %v5875_v58, %v5843_v33  ;;  %v5087_v33 = vld [vmem:[%s6690_s2 + $0x3b8] sm:$0xff]  }
 0x159   : > { %4498 = vmatprep.subr.bf16.mxu0 %v5028_v4  ;;  %4520 = vmatprep.subr.bf16.mxu1 %v5029_v46  ;;  %v1300_v57 = vpack.c.bf16 %v1161_v49, %v1161_v49  ;;  %v1303_v60 = vpack.c.bf16 %v1173_v53, %v1173_v53  ;;  %v1305_v62 = vpack.c.bf16 %v1181_v54, %v1181_v54  ;;  %v5061_v3 = vld [vmem:[%s6690_s2 + $0x2e8] sm:$0xff]   ;;  %v5085_v49 = vld [vmem:[%s6690_s2 + $0x3f8] sm:$0xff]  }
 0x15a   : > { %v5062_v4 = vld [vmem:[%s6690_s2 + $0x228] sm:$0xff]   ;;  %v1197_v53 = vrot.slane %v5875_v58, %v5849_v35 }
 0x15b   : > { %v5063_v46 = vld [vmem:[%s6690_s2 + $0x2a8] sm:$0xff]  }
 0x15c   : > { %4499 = vmatpush3.bf16.msra.mxu0 %v5030_v8  ;;  %4521 = vmatpush3.bf16.msra.mxu1 %v5031_v9  ;;  %v5064_v8 = vld [vmem:[%s6690_s2 + $0x260] sm:$0xff]   ;;  %v1309_v35 = vpack.c.bf16 %v1197_v53, %v1197_v53  ;;  %v5126_v53 = vld [vmem:[%s6690_s2 + $0x428] sm:$0xff]  }
 0x15d   : > { %4500 = vmatprep.subr.bf16.mxu0 %v5032_v10  ;;  %4522 = vmatprep.subr.bf16.mxu1 %v5033_v11  ;;  %v5065_v9 = vld [vmem:[%s6690_s2 + $0x2e0] sm:$0xff]  }
 0x15e   : > { %v5066_v10 = vld [vmem:[%s6690_s2 + $0x220] sm:$0xff]  }
 0x15f   : > { %v5067_v11 = vld [vmem:[%s6690_s2 + $0x2a0] sm:$0xff]  }
 0x160   : > { %4501 = vmatpush3.bf16.msra.mxu0 %v5034_v18  ;;  %4523 = vmatpush3.bf16.msra.mxu1 %v5035_v19  ;;  %v5068_v18 = vld [vmem:[%s6690_s2 + $0x258] sm:$0xff]  }
 0x161   : > { %4502 = vmatprep.subr.bf16.mxu0 %v5036_v20  ;;  %4524 = vmatprep.subr.bf16.mxu1 %v5037_v21  ;;  %v5069_v19 = vld [vmem:[%s6690_s2 + $0x2d8] sm:$0xff]  }
 0x162   : > { %v5070_v20 = vld [vmem:[%s6690_s2 + $0x218] sm:$0xff]  }
 0x163   : > { %v5071_v21 = vld [vmem:[%s6690_s2 + $0x298] sm:$0xff]  }
 0x164   : > { %4503 = vmatpush3.bf16.msra.mxu0 %v5038_v27  ;;  %4525 = vmatpush3.bf16.msra.mxu1 %v5039_v28  ;;  %v5072_v27 = vld [vmem:[%s6690_s2 + $0x250] sm:$0xff]  }
 0x165   : > { %4504 = vmatprep.subr.bf16.mxu0 %v5040_v29  ;;  %4526 = vmatprep.subr.bf16.mxu1 %v5041_v30  ;;  %v5073_v28 = vld [vmem:[%s6690_s2 + $0x2d0] sm:$0xff]  }
 0x166   : > { %v5074_v29 = vld [vmem:[%s6690_s2 + $0x210] sm:$0xff]  }
 0x167   : > { %v5075_v30 = vld [vmem:[%s6690_s2 + $0x290] sm:$0xff]  }
 0x168   : > { %4505 = vmatpush3.bf16.msra.mxu0 %v5042_v31  ;;  %4527 = vmatpush3.bf16.msra.mxu1 %v5043_v37  ;;  %v5076_v31 = vld [vmem:[%s6690_s2 + $0x248] sm:$0xff]  }
 0x169   : > { %4506 = vmatprep.subr.bf16.mxu0 %v5044_v38  ;;  %4528 = vmatprep.subr.bf16.mxu1 %v5045_v40  ;;  %v5077_v37 = vld [vmem:[%s6690_s2 + $0x2c8] sm:$0xff]  }
 0x16a   : > { %v5078_v38 = vld [vmem:[%s6690_s2 + $0x208] sm:$0xff]  }
 0x16b   : > { %v5079_v40 = vld [vmem:[%s6690_s2 + $0x288] sm:$0xff]  }
 0x16c   : > { %4507 = vmatpush3.bf16.msra.mxu0 %v5046_v39  ;;  %4529 = vmatpush3.bf16.msra.mxu1 %v5047_v42  ;;  %v5080_v39 = vld [vmem:[%s6690_s2 + $0x240] sm:$0xff]  }
 0x16d   : > { %4508 = vmatprep.subr.bf16.mxu0 %v5048_v43  ;;  %4530 = vmatprep.subr.bf16.mxu1 %v5049_v44  ;;  %v5081_v42 = vld [vmem:[%s6690_s2 + $0x2c0] sm:$0xff]  }
 0x16e   : > { %v5082_v43 = vld [vmem:[%s6690_s2 + $0x200] sm:$0xff]  }
 0x16f   : > { %v5083_v44 = vld [vmem:[%s6690_s2 + $0x280] sm:$0xff]  }
 0x170   : > { %4509 = vmatpush3.bf16.msra.mxu0 %v5050_v45  ;;  %4531 = vmatpush3.bf16.msra.mxu1 %v5051_v47  ;;  %v1169_v45 = vrot.slane %v5875_v58, %v5828_v2  ;;  %v5084_v47 = vld [vmem:[%s6690_s2 + $0x378] sm:$0xff]  }
 0x171   : > { %4538 = vmatprep.subr.bf16.mxu0 %v5052_v41  ;;  %4560 = vmatprep.subr.bf16.mxu1 %v5053_v52  ;;  %v1189_v41 = vrot.slane %v5875_v58, %v5846_v34  ;;  %v5086_v52 = vld [vmem:[%s6690_s2 + $0x338] sm:$0xff]   ;;  %v5088_v34 = vld [vmem:[%s6690_s2 + $0x370] sm:$0xff]  }
 0x172   : > { %v1302_v54 = vpack.c.bf16 %v1169_v45, %v1169_v45  ;;  %v5090_v58 = vld [vmem:[%s6690_s2 + $0x330] sm:$0xff]   ;;  %v1308_v45 = vpack.c.bf16 %v5907_v6, %v5907_v6 }
 0x173   : > { %3488 = vmatmul.mubr.bf16.vlgmr.msra.gmra.mxu0 %v1298_v55  ;;  %3528 = vmatmul.mubr.bf16.vlgmr.msra.gmra.mxu1 %v1300_v57  ;;  %v1307_v55 = vpack.c.bf16 %v1189_v41, %v1189_v41  ;;  %v5089_v57 = vld [vmem:[%s6690_s2 + $0x3f0] sm:$0xff]  }
 0x174   : > { %4539 = vmatpush3.bf16.msra.mxu0 %v5054_v36  ;;  %3567 = vmatprep.mubr.bf16.mxu0 %v1303_v60  ;;  %v1304_v36 = vpack.c.bf16 %v1177_v48, %v1177_v48  ;;  %v5092_v60 = vld [vmem:[%s6690_s2 + $0x368] sm:$0xff]   ;;  %v5122_v6 = vld [vmem:[%s6690_s2 + $0x430] sm:$0xff]  }
 0x175   : > { %4561 = vmatpush3.bf16.msra.mxu1 %v5055_v59  ;;  %3607 = vmatprep.mubr.bf16.mxu1 %v1305_v62  ;;  %v5091_v59 = vld [vmem:[%s6690_s2 + $0x3b0] sm:$0xff]   ;;  %v5095_v62 = vld [vmem:[%s6690_s2 + $0x3a8] sm:$0xff]  }
 0x176   : > { %4540 = vmatprep.subr.bf16.mxu0 %v5056_v61  ;;  %4562 = vmatprep.subr.bf16.mxu1 %v5057_v32  ;;  %v5093_v61 = vld [vmem:[%s6690_s2 + $0x3e8] sm:$0xff]   ;;  %v5123_v41 = vld [vmem:[%s6690_s2 + $0x4b0] sm:$0xff]  }
 0x177   : > { %v5094_v32 = vld [vmem:[%s6690_s2 + $0x328] sm:$0xff]  }
 0x178   : > { %4541 = vmatpush3.bf16.msra.mxu0 %v5058_v63  ;;  %v5096_v63 = vld [vmem:[%s6690_s2 + $0x360] sm:$0xff]  }
 0x179   : > { %4563 = vmatpush3.bf16.msra.mxu1 %v5059_v0  ;;  %4542 = vmatprep.subr.bf16.mxu0 %v5060_v1  ;;  %v5097_v0 = vld [vmem:[%s6690_s2 + $0x3e0] sm:$0xff]  }
 0x17a   : > { %4564 = vmatprep.subr.bf16.mxu1 %v5061_v3  ;;  %v5098_v1 = vld [vmem:[%s6690_s2 + $0x320] sm:$0xff]  }
 0x17b   : > { %v5099_v3 = vld [vmem:[%s6690_s2 + $0x3a0] sm:$0xff]  }
 0x17c   : > { %4543 = vmatpush3.bf16.msra.mxu0 %v5062_v4  ;;  %v5100_v4 = vld [vmem:[%s6690_s2 + $0x358] sm:$0xff]  }
 0x17d   : > { %4565 = vmatpush3.bf16.msra.mxu1 %v5063_v46  ;;  %4544 = vmatprep.subr.bf16.mxu0 %v5064_v8  ;;  %v5101_v46 = vld [vmem:[%s6690_s2 + $0x3d8] sm:$0xff]  }
 0x17e   : > { %4566 = vmatprep.subr.bf16.mxu1 %v5065_v9  ;;  %v5102_v8 = vld [vmem:[%s6690_s2 + $0x318] sm:$0xff]  }
 0x17f   : > { %v5103_v9 = vld [vmem:[%s6690_s2 + $0x398] sm:$0xff]  }
 0x180   : > { %4545 = vmatpush3.bf16.msra.mxu0 %v5066_v10  ;;  %v5104_v10 = vld [vmem:[%s6690_s2 + $0x350] sm:$0xff]  }
 0x181   : > { %4567 = vmatpush3.bf16.msra.mxu1 %v5067_v11  ;;  %4546 = vmatprep.subr.bf16.mxu0 %v5068_v18  ;;  %v5105_v11 = vld [vmem:[%s6690_s2 + $0x3d0] sm:$0xff]  }
 0x182   : > { %4568 = vmatprep.subr.bf16.mxu1 %v5069_v19  ;;  %v5106_v18 = vld [vmem:[%s6690_s2 + $0x310] sm:$0xff]  }
 0x183   : > { %v5107_v19 = vld [vmem:[%s6690_s2 + $0x390] sm:$0xff]  }
 0x184   : > { %4547 = vmatpush3.bf16.msra.mxu0 %v5070_v20  ;;  %v5108_v20 = vld [vmem:[%s6690_s2 + $0x348] sm:$0xff]  }
 0x185   : > { %4569 = vmatpush3.bf16.msra.mxu1 %v5071_v21  ;;  %4548 = vmatprep.subr.bf16.mxu0 %v5072_v27  ;;  %v5109_v21 = vld [vmem:[%s6690_s2 + $0x3c8] sm:$0xff]  }
 0x186   : > { %4570 = vmatprep.subr.bf16.mxu1 %v5073_v28  ;;  %v5110_v27 = vld [vmem:[%s6690_s2 + $0x308] sm:$0xff]  }
 0x187   : > { %v5111_v28 = vld [vmem:[%s6690_s2 + $0x388] sm:$0xff]  }
 0x188   : > { %4549 = vmatpush3.bf16.msra.mxu0 %v5074_v29  ;;  %v5112_v29 = vld [vmem:[%s6690_s2 + $0x340] sm:$0xff]  }
 0x189   : > { %4571 = vmatpush3.bf16.msra.mxu1 %v5075_v30  ;;  %4550 = vmatprep.subr.bf16.mxu0 %v5076_v31  ;;  %v5113_v30 = vld [vmem:[%s6690_s2 + $0x3c0] sm:$0xff]  }
 0x18a   : > { %4572 = vmatprep.subr.bf16.mxu1 %v5077_v37  ;;  %v5114_v31 = vld [vmem:[%s6690_s2 + $0x300] sm:$0xff]  }
 0x18b   : > { %v5115_v37 = vld [vmem:[%s6690_s2 + $0x380] sm:$0xff]  }
 0x18c   : > { %4551 = vmatpush3.bf16.msra.mxu0 %v5078_v38  ;;  %v5116_v38 = vld [vmem:[%s6690_s2 + $0x478] sm:$0xff]  }
 0x18d   : > { %4573 = vmatpush3.bf16.msra.mxu1 %v5079_v40  ;;  %4552 = vmatprep.subr.bf16.mxu0 %v5080_v39  ;;  %v5117_v40 = vld [vmem:[%s6690_s2 + $0x4f8] sm:$0xff]   ;;  %v1205_v39 = vrot.slane %v5865_v50, %v5834_v56 }
 0x18e   : > { %4574 = vmatprep.subr.bf16.mxu1 %v5081_v42  ;;  %v5118_v42 = vld [vmem:[%s6690_s2 + $0x438] sm:$0xff]  }
 0x18f   : > { %v1311_v48 = vpack.c.bf16 %v1205_v39, %v1205_v39  ;;  %v5161_v39 = vld [vmem:[%s6690_s2 + $0x5e0] sm:$0xff]  }
 0x190   : > { %4553 = vmatpush3.bf16.msra.mxu0 %v5082_v43  ;;  %v1306_v43 = vpack.c.bf16 %v5903_v5, %v5903_v5  ;;  %v1313_v5 = vpack.c.bf16 %v5911_v7, %v5911_v7  ;;  %v5125_v7 = vld [vmem:[%s6690_s2 + $0x4e8] sm:$0xff]  }
 0x191   : > { %4575 = vmatpush3.bf16.msra.mxu1 %v5083_v44  ;;  %4582 = vmatprep.subr.bf16.mxu0 %v5084_v47  ;;  %v5119_v44 = vld [vmem:[%s6690_s2 + $0x4b8] sm:$0xff]   ;;  %v5120_v47 = vld [vmem:[%s6690_s2 + $0x470] sm:$0xff]  }
 0x192   : > { %4604 = vmatprep.subr.bf16.mxu1 %v5085_v49  ;;  %v5121_v49 = vld [vmem:[%s6690_s2 + $0x4f0] sm:$0xff]  }
 0x193   : > { %3568 = vmatmul.mubr.bf16.vlgmr.msra.gmra.mxu0 %v1302_v54  ;;  %v5127_v54 = vld [vmem:[%s6690_s2 + $0x4a8] sm:$0xff]  }
 0x194   : > { %3608 = vmatmul.mubr.bf16.vlgmr.msra.gmra.mxu1 %v1304_v36  ;;  %4583 = vmatpush3.bf16.msra.mxu0 %v5086_v52  ;;  %v5124_v52 = vld [vmem:[%s6690_s2 + $0x468] sm:$0xff]   ;;  %v5129_v36 = vld [vmem:[%s6690_s2 + $0x4e0] sm:$0xff]  }
 0x195   : > { %3647 = vmatprep.mubr.bf16.mxu0 %v1307_v55  ;;  %4605 = vmatpush3.bf16.msra.mxu1 %v5087_v33  ;;  %v5128_v33 = vld [vmem:[%s6690_s2 + $0x460] sm:$0xff]  }
 0x196   : > { %3687 = vmatprep.mubr.bf16.mxu1 %v1309_v35  ;;  %4584 = vmatprep.subr.bf16.mxu0 %v5088_v34  ;;  %v5130_v34 = vld [vmem:[%s6690_s2 + $0x420] sm:$0xff]   ;;  %v5133_v35 = vld [vmem:[%s6690_s2 + $0x4d8] sm:$0xff]  }
 0x197   : > { %4606 = vmatprep.subr.bf16.mxu1 %v5089_v57  ;;  %v5131_v55 = vld [vmem:[%s6690_s2 + $0x4a0] sm:$0xff]   ;;  %v5132_v57 = vld [vmem:[%s6690_s2 + $0x458] sm:$0xff]  }
 0x198   : > { %4585 = vmatpush3.bf16.msra.mxu0 %v5090_v58  ;;  %v5134_v58 = vld [vmem:[%s6690_s2 + $0x418] sm:$0xff]  }
 0x199   : > { %4607 = vmatpush3.bf16.msra.mxu1 %v5091_v59  ;;  %4586 = vmatprep.subr.bf16.mxu0 %v5092_v60  ;;  %v5135_v59 = vld [vmem:[%s6690_s2 + $0x498] sm:$0xff]   ;;  %v5136_v60 = vld [vmem:[%s6690_s2 + $0x450] sm:$0xff]  }
 0x19a   : > { %4608 = vmatprep.subr.bf16.mxu1 %v5093_v61  ;;  %v5137_v61 = vld [vmem:[%s6690_s2 + $0x4d0] sm:$0xff]  }
 0x19c   : > { %4587 = vmatpush3.bf16.msra.mxu0 %v5094_v32  ;;  %v5138_v32 = vld [vmem:[%s6690_s2 + $0x410] sm:$0xff]  }
 0x19d   : > { %4609 = vmatpush3.bf16.msra.mxu1 %v5095_v62  ;;  %4588 = vmatprep.subr.bf16.mxu0 %v5096_v63  ;;  %v5139_v62 = vld [vmem:[%s6690_s2 + $0x490] sm:$0xff]   ;;  %v5140_v63 = vld [vmem:[%s6690_s2 + $0x448] sm:$0xff]  }
 0x19e   : > { %4610 = vmatprep.subr.bf16.mxu1 %v5097_v0  ;;  %v5141_v0 = vld [vmem:[%s6690_s2 + $0x4c8] sm:$0xff]  }
 0x1a0   : > { %4589 = vmatpush3.bf16.msra.mxu0 %v5098_v1  ;;  %v5142_v1 = vld [vmem:[%s6690_s2 + $0x408] sm:$0xff]  }
 0x1a1   : > { %4611 = vmatpush3.bf16.msra.mxu1 %v5099_v3  ;;  %4590 = vmatprep.subr.bf16.mxu0 %v5100_v4  ;;  %v5143_v3 = vld [vmem:[%s6690_s2 + $0x488] sm:$0xff]   ;;  %v5144_v4 = vld [vmem:[%s6690_s2 + $0x440] sm:$0xff]  }
 0x1a2   : > { %4612 = vmatprep.subr.bf16.mxu1 %v5101_v46  ;;  %v5145_v46 = vld [vmem:[%s6690_s2 + $0x4c0] sm:$0xff]  }
 0x1a4   : > { %4591 = vmatpush3.bf16.msra.mxu0 %v5102_v8  ;;  %v5146_v8 = vld [vmem:[%s6690_s2 + $0x400] sm:$0xff]  }
 0x1a5   : > { %4613 = vmatpush3.bf16.msra.mxu1 %v5103_v9  ;;  %4592 = vmatprep.subr.bf16.mxu0 %v5104_v10  ;;  %v5147_v9 = vld [vmem:[%s6690_s2 + $0x480] sm:$0xff]   ;;  %v1201_v10 = vrot.slane %v5865_v50, %v5828_v2  ;;  %v5151_v50 = vld [vmem:[%s6690_s2 + $0x5b8] sm:$0xff]  }
 0x1a6   : > { %4614 = vmatprep.subr.bf16.mxu1 %v5105_v11  ;;  %v5148_v11 = vld [vmem:[%s6690_s2 + $0x578] sm:$0xff]  }
 0x1a8   : > { %4593 = vmatpush3.bf16.msra.mxu0 %v5106_v18  ;;  %v5149_v18 = vld [vmem:[%s6690_s2 + $0x5f8] sm:$0xff]  }
 0x1a9   : > { %4615 = vmatpush3.bf16.msra.mxu1 %v5107_v19  ;;  %4594 = vmatprep.subr.bf16.mxu0 %v5108_v20  ;;  %v5150_v19 = vld [vmem:[%s6690_s2 + $0x538] sm:$0xff]   ;;  %v1310_v20 = vpack.c.bf16 %v1201_v10, %v1201_v10  ;;  %v5195_v10 = vld [vmem:[%s6690_s2 + $0x6a0] sm:$0xff]  }
 0x1aa   : > { %4616 = vmatprep.subr.bf16.mxu1 %v5109_v21  ;;  %v1312_v21 = vpack.c.bf16 %v5927_v12, %v5927_v12  ;;  %v5154_v12 = vld [vmem:[%s6690_s2 + $0x530] sm:$0xff]  }
 0x1ac   : > { %4595 = vmatpush3.bf16.msra.mxu0 %v5110_v27  ;;  %v5152_v27 = vld [vmem:[%s6690_s2 + $0x570] sm:$0xff]  }
 0x1ad   : > { %4617 = vmatpush3.bf16.msra.mxu1 %v5111_v28  ;;  %4596 = vmatprep.subr.bf16.mxu0 %v5112_v29  ;;  %v1315_v28 = vpack.c.bf16 %v5931_v13, %v5931_v13  ;;  %v5153_v29 = vld [vmem:[%s6690_s2 + $0x5f0] sm:$0xff]   ;;  %v5156_v13 = vld [vmem:[%s6690_s2 + $0x568] sm:$0xff]  }
 0x1ae   : > { %4618 = vmatprep.subr.bf16.mxu1 %v5113_v30  ;;  %v1317_v30 = vpack.c.bf16 %v5935_v14, %v5935_v14  ;;  %v5157_v14 = vld [vmem:[%s6690_s2 + $0x5e8] sm:$0xff]  }
 0x1b0   : > { %4597 = vmatpush3.bf16.msra.mxu0 %v5114_v31  ;;  %v5155_v31 = vld [vmem:[%s6690_s2 + $0x5b0] sm:$0xff]  }
 0x1b1   : > { %4619 = vmatpush3.bf16.msra.mxu1 %v5115_v37  ;;  %4626 = vmatprep.subr.bf16.mxu0 %v5116_v38  ;;  %v5158_v37 = vld [vmem:[%s6690_s2 + $0x528] sm:$0xff]  }
 0x1b2   : > { %4648 = vmatprep.subr.bf16.mxu1 %v5117_v40  ;;  %v5159_v38 = vld [vmem:[%s6690_s2 + $0x5a8] sm:$0xff]   ;;  %v5160_v40 = vld [vmem:[%s6690_s2 + $0x560] sm:$0xff]  }
 0x1b3   : > { %3648 = vmatmul.mubr.bf16.vlgmr.msra.gmra.mxu0 %v1306_v43  ;;  %v5163_v43 = vld [vmem:[%s6690_s2 + $0x5a0] sm:$0xff]  }
 0x1b4   : > { %3688 = vmatmul.mubr.bf16.vlgmr.msra.gmra.mxu1 %v1308_v45  ;;  %4627 = vmatpush3.bf16.msra.mxu0 %v5118_v42  ;;  %v5162_v42 = vld [vmem:[%s6690_s2 + $0x520] sm:$0xff]   ;;  %v5165_v45 = vld [vmem:[%s6690_s2 + $0x5d8] sm:$0xff]  }
 0x1b5   : > { %3727 = vmatprep.mubr.bf16.mxu0 %v1311_v48  ;;  %4649 = vmatpush3.bf16.msra.mxu1 %v5119_v44  ;;  %v5164_v44 = vld [vmem:[%s6690_s2 + $0x558] sm:$0xff]  }
 0x1b6   : > { %3767 = vmatprep.mubr.bf16.mxu1 %v1313_v5  ;;  %4628 = vmatprep.subr.bf16.mxu0 %v5120_v47  ;;  %v5166_v47 = vld [vmem:[%s6690_s2 + $0x518] sm:$0xff]   ;;  %v5169_v5 = vld [vmem:[%s6690_s2 + $0x5d0] sm:$0xff]  }
 0x1b7   : > { %4650 = vmatprep.subr.bf16.mxu1 %v5121_v49  ;;  %v5167_v48 = vld [vmem:[%s6690_s2 + $0x598] sm:$0xff]   ;;  %v5168_v49 = vld [vmem:[%s6690_s2 + $0x550] sm:$0xff]  }
 0x1b8   : > { %4629 = vmatpush3.bf16.msra.mxu0 %v5122_v6  ;;  %v5170_v6 = vld [vmem:[%s6690_s2 + $0x510] sm:$0xff]  }
 0x1b9   : > { %4651 = vmatpush3.bf16.msra.mxu1 %v5123_v41  ;;  %4630 = vmatprep.subr.bf16.mxu0 %v5124_v52  ;;  %v5171_v41 = vld [vmem:[%s6690_s2 + $0x590] sm:$0xff]   ;;  %v5172_v52 = vld [vmem:[%s6690_s2 + $0x548] sm:$0xff]  }
 0x1ba   : > { %4652 = vmatprep.subr.bf16.mxu1 %v5125_v7  ;;  %v5173_v7 = vld [vmem:[%s6690_s2 + $0x5c8] sm:$0xff]  }
 0x1bc   : > { %4631 = vmatpush3.bf16.msra.mxu0 %v5126_v53  ;;  %v5174_v53 = vld [vmem:[%s6690_s2 + $0x508] sm:$0xff]  }
 0x1bd   : > { %4653 = vmatpush3.bf16.msra.mxu1 %v5127_v54  ;;  %4632 = vmatprep.subr.bf16.mxu0 %v5128_v33  ;;  %v5175_v54 = vld [vmem:[%s6690_s2 + $0x588] sm:$0xff]   ;;  %v5176_v33 = vld [vmem:[%s6690_s2 + $0x540] sm:$0xff]  }
 0x1be   : > { %4654 = vmatprep.subr.bf16.mxu1 %v5129_v36  ;;  %v5177_v36 = vld [vmem:[%s6690_s2 + $0x5c0] sm:$0xff]  }
 0x1c0   : > { %4633 = vmatpush3.bf16.msra.mxu0 %v5130_v34  ;;  %v5178_v34 = vld [vmem:[%s6690_s2 + $0x500] sm:$0xff]  }
 0x1c1   : > { %4655 = vmatpush3.bf16.msra.mxu1 %v5131_v55  ;;  %4634 = vmatprep.subr.bf16.mxu0 %v5132_v57  ;;  %v5179_v55 = vld [vmem:[%s6690_s2 + $0x580] sm:$0xff]   ;;  %v5180_v57 = vld [vmem:[%s6690_s2 + $0x678] sm:$0xff]  }
 0x1c2   : > { %4656 = vmatprep.subr.bf16.mxu1 %v5133_v35  ;;  %v5181_v35 = vld [vmem:[%s6690_s2 + $0x6f8] sm:$0xff]  }
 0x1c4   : > { %4635 = vmatpush3.bf16.msra.mxu0 %v5134_v58  ;;  %v1237_v58 = vrot.slane %v5867_v51, %v5834_v56  ;;  %v5184_v56 = vld [vmem:[%s6690_s2 + $0x670] sm:$0xff]  }
 0x1c5   : > { %4657 = vmatpush3.bf16.msra.mxu1 %v5135_v59  ;;  %4636 = vmatprep.subr.bf16.mxu0 %v5136_v60  ;;  %v5182_v59 = vld [vmem:[%s6690_s2 + $0x638] sm:$0xff]   ;;  %v1314_v60 = vpack.c.bf16 %v5939_v15, %v5939_v15  ;;  %v1321_v15 = vpack.c.bf16 %v5947_v17, %v5947_v17  ;;  %v5189_v17 = vld [vmem:[%s6690_s2 + $0x6e8] sm:$0xff]  }
 0x1c6   : > { %4658 = vmatprep.subr.bf16.mxu1 %v5137_v61  ;;  %v5183_v61 = vld [vmem:[%s6690_s2 + $0x6b8] sm:$0xff]  }
 0x1c8   : > { %4637 = vmatpush3.bf16.msra.mxu0 %v5138_v32  ;;  %v1316_v32 = vpack.c.bf16 %v5943_v16, %v5943_v16  ;;  %v5186_v16 = vld [vmem:[%s6690_s2 + $0x630] sm:$0xff]  }
 0x1c9   : > { %4659 = vmatpush3.bf16.msra.mxu1 %v5139_v62  ;;  %4638 = vmatprep.subr.bf16.mxu0 %v5140_v63  ;;  %v1319_v62 = vpack.c.bf16 %v1237_v58, %v1237_v58  ;;  %v5185_v63 = vld [vmem:[%s6690_s2 + $0x6f0] sm:$0xff]  }
 0x1ca   : > { %4660 = vmatprep.subr.bf16.mxu1 %v5141_v0  ;;  %v5187_v0 = vld [vmem:[%s6690_s2 + $0x6b0] sm:$0xff]  }
 0x1cc   : > { %4639 = vmatpush3.bf16.msra.mxu0 %v5142_v1  ;;  %v5188_v1 = vld [vmem:[%s6690_s2 + $0x668] sm:$0xff]  }
 0x1cd   : > { %4661 = vmatpush3.bf16.msra.mxu1 %v5143_v3  ;;  %4640 = vmatprep.subr.bf16.mxu0 %v5144_v4  ;;  %v5190_v3 = vld [vmem:[%s6690_s2 + $0x628] sm:$0xff]  }
 0x1ce   : > { %4662 = vmatprep.subr.bf16.mxu1 %v5145_v46  ;;  %v5191_v4 = vld [vmem:[%s6690_s2 + $0x6a8] sm:$0xff]   ;;  %v5192_v46 = vld [vmem:[%s6690_s2 + $0x660] sm:$0xff]  }
 0x1d0   : > { %4641 = vmatpush3.bf16.msra.mxu0 %v5146_v8  ;;  %v5193_v8 = vld [vmem:[%s6690_s2 + $0x6e0] sm:$0xff]  }
 0x1d1   : > { %4663 = vmatpush3.bf16.msra.mxu1 %v5147_v9  ;;  %4670 = vmatprep.subr.bf16.mxu0 %v5148_v11  ;;  %v5194_v9 = vld [vmem:[%s6690_s2 + $0x620] sm:$0xff]   ;;  %v5196_v11 = vld [vmem:[%s6690_s2 + $0x658] sm:$0xff]  }
 0x1d2   : > { %4692 = vmatprep.subr.bf16.mxu1 %v5149_v18  ;;  %v5197_v18 = vld [vmem:[%s6690_s2 + $0x6d8] sm:$0xff]  }
 0x1d3   : > { %3728 = vmatmul.mubr.bf16.vlgmr.msra.gmra.mxu0 %v1310_v20  ;;  %v5199_v20 = vld [vmem:[%s6690_s2 + $0x698] sm:$0xff]  }
 0x1d4   : > { %3768 = vmatmul.mubr.bf16.vlgmr.msra.gmra.mxu1 %v1312_v21  ;;  %4671 = vmatpush3.bf16.msra.mxu0 %v5150_v19  ;;  %v5198_v19 = vld [vmem:[%s6690_s2 + $0x618] sm:$0xff]   ;;  %v5201_v21 = vld [vmem:[%s6690_s2 + $0x6d0] sm:$0xff]  }
 0x1d5   : > { %3807 = vmatprep.mubr.bf16.mxu0 %v1315_v28  ;;  %4693 = vmatpush3.bf16.msra.mxu1 %v5151_v50  ;;  %v5200_v50 = vld [vmem:[%s6690_s2 + $0x650] sm:$0xff]  }
 0x1d6   : > { %3847 = vmatprep.mubr.bf16.mxu1 %v1317_v30  ;;  %4672 = vmatprep.subr.bf16.mxu0 %v5152_v27  ;;  %v5202_v27 = vld [vmem:[%s6690_s2 + $0x610] sm:$0xff]   ;;  %v5205_v30 = vld [vmem:[%s6690_s2 + $0x6c8] sm:$0xff]  }
 0x1d7   : > { %4694 = vmatprep.subr.bf16.mxu1 %v5153_v29  ;;  %v5203_v28 = vld [vmem:[%s6690_s2 + $0x690] sm:$0xff]   ;;  %v5204_v29 = vld [vmem:[%s6690_s2 + $0x648] sm:$0xff]  }
 0x1d8   : > { %4673 = vmatpush3.bf16.msra.mxu0 %v5154_v12  ;;  %v5206_v12 = vld [vmem:[%s6690_s2 + $0x608] sm:$0xff]  }
 0x1d9   : > { %4695 = vmatpush3.bf16.msra.mxu1 %v5155_v31  ;;  %4674 = vmatprep.subr.bf16.mxu0 %v5156_v13  ;;  %v5207_v31 = vld [vmem:[%s6690_s2 + $0x688] sm:$0xff]   ;;  %v5208_v13 = vld [vmem:[%s6690_s2 + $0x640] sm:$0xff]  }
 0x1da   : > { %4696 = vmatprep.subr.bf16.mxu1 %v5157_v14  ;;  %v5209_v14 = vld [vmem:[%s6690_s2 + $0x6c0] sm:$0xff]  }
 0x1dc   : > { %4675 = vmatpush3.bf16.msra.mxu0 %v5158_v37  ;;  %v5210_v37 = vld [vmem:[%s6690_s2 + $0x600] sm:$0xff]  }
 0x1dd   : > { %4697 = vmatpush3.bf16.msra.mxu1 %v5159_v38  ;;  %4676 = vmatprep.subr.bf16.mxu0 %v5160_v40  ;;  %v5211_v38 = vld [vmem:[%s6690_s2 + $0x680] sm:$0xff]   ;;  %v1233_v40 = vrot.slane %v5867_v51, %v5828_v2  ;;  %v5215_v2 = vld [vmem:[%s6690_s2 + $0x7b8] sm:$0xff]   ;;  %v1320_v51 = vpack.c.bf16 %v5963_v22, %v5963_v22  ;;  %v1325_v22 = vpack.c.bf16 %v5971_v24, %v5971_v24  ;;  %v5220_v24 = vld [vmem:[%s6690_s2 + $0x768] sm:$0xff]  }
 0x1de   : > { %4698 = vmatprep.subr.bf16.mxu1 %v5161_v39  ;;  %v5212_v39 = vld [vmem:[%s6690_s2 + $0x778] sm:$0xff]  }
 0x1e0   : > { %4677 = vmatpush3.bf16.msra.mxu0 %v5162_v42  ;;  %v5213_v42 = vld [vmem:[%s6690_s2 + $0x7f8] sm:$0xff]  }
 0x1e1   : > { %4699 = vmatpush3.bf16.msra.mxu1 %v5163_v43  ;;  %4678 = vmatprep.subr.bf16.mxu0 %v5164_v44  ;;  %v5214_v43 = vld [vmem:[%s6690_s2 + $0x738] sm:$0xff]   ;;  %v1318_v44 = vpack.c.bf16 %v1233_v40, %v1233_v40 }
 0x1e2   : > { %4700 = vmatprep.subr.bf16.mxu1 %v5165_v45  ;;  %v5216_v45 = vld [vmem:[%s6690_s2 + $0x770] sm:$0xff]  }
 0x1e4   : > { %4679 = vmatpush3.bf16.msra.mxu0 %v5166_v47 }
 0x1e5   : > { %4701 = vmatpush3.bf16.msra.mxu1 %v5167_v48  ;;  %4680 = vmatprep.subr.bf16.mxu0 %v5168_v49  ;;  %v1323_v49 = vpack.c.bf16 %v5967_v23, %v5967_v23 }
 0x1e6   : > { %4702 = vmatprep.subr.bf16.mxu1 %v5169_v5  ;;  %v5217_v5 = vld [vmem:[%s6690_s2 + $0x7f0] sm:$0xff]  }
 0x1e8   : > { %4681 = vmatpush3.bf16.msra.mxu0 %v5170_v6  ;;  %v5218_v6 = vld [vmem:[%s6690_s2 + $0x730] sm:$0xff]  }
 0x1e9   : > { %4703 = vmatpush3.bf16.msra.mxu1 %v5171_v41  ;;  %4682 = vmatprep.subr.bf16.mxu0 %v5172_v52  ;;  %v1838_v41 = vld [vmem:[%s6691_s3] sm:$0x1] }
 0x1ea   : > { %4704 = vmatprep.subr.bf16.mxu1 %v5173_v7  ;;  %v5219_v7 = vld [vmem:[%s6690_s2 + $0x7b0] sm:$0xff]  }
 0x1ec   : > { %4683 = vmatpush3.bf16.msra.mxu0 %v5174_v53 }
 0x1ed   : > { %4705 = vmatpush3.bf16.msra.mxu1 %v5175_v54  ;;  %4684 = vmatprep.subr.bf16.mxu0 %v5176_v33  ;;  %v5221_v33 = vld [vmem:[%s6690_s2 + $0x7e8] sm:$0xff]  }
 0x1ee   : > { %4706 = vmatprep.subr.bf16.mxu1 %v5177_v36 }
 0x1f0   : > { %4685 = vmatpush3.bf16.msra.mxu0 %v5178_v34 }
 0x1f1   : > { %4707 = vmatpush3.bf16.msra.mxu1 %v5179_v55  ;;  %4714 = vmatprep.subr.bf16.mxu0 %v5180_v57  ;;  %v5222_v57 = vld [vmem:[%s6690_s2 + $0x728] sm:$0xff]  }
 0x1f2   : > { %4736 = vmatprep.subr.bf16.mxu1 %v5181_v35 }
 0x1f3   : > { %3808 = vmatmul.mubr.bf16.vlgmr.msra.gmra.mxu0 %v1314_v60  ;;  %v5224_v60 = vld [vmem:[%s6690_s2 + $0x760] sm:$0xff]  }
 0x1f4   : > { %3848 = vmatmul.mubr.bf16.vlgmr.msra.gmra.mxu1 %v1316_v32  ;;  %4715 = vmatpush3.bf16.msra.mxu0 %v5182_v59  ;;  %v5223_v59 = vld [vmem:[%s6690_s2 + $0x7a8] sm:$0xff]   ;;  %v5225_v32 = vld [vmem:[%s6690_s2 + $0x7e0] sm:$0xff]  }
 0x1f5   : > { %3887 = vmatprep.mubr.bf16.mxu0 %v1319_v62  ;;  %4737 = vmatpush3.bf16.msra.mxu1 %v5183_v61  ;;  %v5227_v62 = vld [vmem:[%s6690_s2 + $0x7a0] sm:$0xff]  }
 0x1f6   : > { %3927 = vmatprep.mubr.bf16.mxu1 %v1321_v15  ;;  %4716 = vmatprep.subr.bf16.mxu0 %v5184_v56  ;;  %v5226_v56 = vld [vmem:[%s6690_s2 + $0x720] sm:$0xff]   ;;  %v5229_v15 = vld [vmem:[%s6690_s2 + $0x7d8] sm:$0xff]  }
 0x1f7   : > { %4738 = vmatprep.subr.bf16.mxu1 %v5185_v63  ;;  %v5228_v63 = vld [vmem:[%s6690_s2 + $0x758] sm:$0xff]  }
 0x1f8   : > { %4717 = vmatpush3.bf16.msra.mxu0 %v5186_v16  ;;  %v5230_v16 = vld [vmem:[%s6690_s2 + $0x718] sm:$0xff]  }
 0x1f9   : > { %4739 = vmatpush3.bf16.msra.mxu1 %v5187_v0  ;;  %4718 = vmatprep.subr.bf16.mxu0 %v5188_v1  ;;  %v5231_v0 = vld [vmem:[%s6690_s2 + $0x798] sm:$0xff]   ;;  %v5232_v1 = vld [vmem:[%s6690_s2 + $0x750] sm:$0xff]  }
 0x1fa   : > { %4740 = vmatprep.subr.bf16.mxu1 %v5189_v17  ;;  %v5233_v17 = vld [vmem:[%s6690_s2 + $0x7d0] sm:$0xff]  }
 0x1fc   : > { %4719 = vmatpush3.bf16.msra.mxu0 %v5190_v3  ;;  %v5234_v3 = vld [vmem:[%s6690_s2 + $0x710] sm:$0xff]  }
 0x1fd   : > { %4741 = vmatpush3.bf16.msra.mxu1 %v5191_v4  ;;  %4720 = vmatprep.subr.bf16.mxu0 %v5192_v46  ;;  %v5235_v4 = vld [vmem:[%s6690_s2 + $0x790] sm:$0xff]   ;;  %v5236_v46 = vld [vmem:[%s6690_s2 + $0x748] sm:$0xff]  }
 0x1fe   : > { %4742 = vmatprep.subr.bf16.mxu1 %v5193_v8  ;;  %v5237_v8 = vld [vmem:[%s6690_s2 + $0x7c8] sm:$0xff]  }
 0x200   : > { %4721 = vmatpush3.bf16.msra.mxu0 %v5194_v9  ;;  %v5238_v9 = vld [vmem:[%s6690_s2 + $0x708] sm:$0xff]  }
 0x201   : > { %4743 = vmatpush3.bf16.msra.mxu1 %v5195_v10  ;;  %4722 = vmatprep.subr.bf16.mxu0 %v5196_v11  ;;  %v5239_v10 = vld [vmem:[%s6690_s2 + $0x788] sm:$0xff]   ;;  %v5240_v11 = vld [vmem:[%s6690_s2 + $0x740] sm:$0xff]  }
 0x202   : > { %4744 = vmatprep.subr.bf16.mxu1 %v5197_v18  ;;  %v5241_v18 = vld [vmem:[%s6690_s2 + $0x7c0] sm:$0xff]  }
 0x204   : > { %4723 = vmatpush3.bf16.msra.mxu0 %v5198_v19  ;;  %v5242_v19 = vld [vmem:[%s6690_s2 + $0x700] sm:$0xff]  }
 0x205   : > { %4745 = vmatpush3.bf16.msra.mxu1 %v5199_v20  ;;  %4724 = vmatprep.subr.bf16.mxu0 %v5200_v50  ;;  %v5243_v20 = vld [vmem:[%s6690_s2 + $0x780] sm:$0xff]   ;;  %v1322_v50 = vpack.c.bf16 %v5975_v25, %v5975_v25 }
 0x206   : > { %4746 = vmatprep.subr.bf16.mxu1 %v5201_v21  ;;  %v1324_v21 = vpack.c.bf16 %v5979_v26, %v5979_v26 }
 0x208   : > { %4725 = vmatpush3.bf16.msra.mxu0 %v5202_v27 }
 0x209   : > { %4747 = vmatpush3.bf16.msra.mxu1 %v5203_v28  ;;  %4726 = vmatprep.subr.bf16.mxu0 %v5204_v29 }
 0x20a   : > { %4748 = vmatprep.subr.bf16.mxu1 %v5205_v30 }
 0x20c   : > { %4727 = vmatpush3.bf16.msra.mxu0 %v5206_v12 }
 0x20d   : > { %4749 = vmatpush3.bf16.msra.mxu1 %v5207_v31  ;;  %4728 = vmatprep.subr.bf16.mxu0 %v5208_v13 }
 0x20e   : > { %4750 = vmatprep.subr.bf16.mxu1 %v5209_v14 }
 0x210   : > { %4729 = vmatpush3.bf16.msra.mxu0 %v5210_v37 }
 0x211   : > { %4751 = vmatpush3.bf16.msra.mxu1 %v5211_v38  ;;  %4758 = vmatprep.subr.bf16.mxu0 %v5212_v39 }
 0x212   : > { %4780 = vmatprep.subr.bf16.mxu1 %v5213_v42 }
 0x213   : > { %3888 = vmatmul.mubr.bf16.vlgmr.msra.gmra.mxu0 %v1318_v44  ;;  %v4466_v47 = vpop.f32.mrf.mxu0  ;;  %v4488_v48 = vpop.f32.mrf.mxu1 }
 0x214   : > { %3928 = vmatmul.mubr.bf16.vlgmr.msra.gmra.mxu1 %v1320_v51  ;;  %4759 = vmatpush3.bf16.msra.mxu0 %v5214_v43 }
 0x215   : > { %3967 = vmatprep.mubr.bf16.mxu0 %v1323_v49  ;;  %4781 = vmatpush3.bf16.msra.mxu1 %v5215_v2  ;;  %v4467_v23 = vpop.f32.mrf.mxu0  ;;  %v4489_v52 = vpop.f32.mrf.mxu1 }
 0x216   : > { %4007 = vmatprep.mubr.bf16.mxu1 %v1325_v22  ;;  %v4468_v53 = vadd.f32 %v4467_v23, %v4466_v47  ;;  %v4490_v54 = vadd.f32 %v4489_v52, %v4488_v48  ;;  %4760 = vmatprep.subr.bf16.mxu0 %v5216_v45 }
 0x217   : > { %4782 = vmatprep.subr.bf16.mxu1 %v5217_v5  ;;  %v4469_v36 = vpop.f32.mrf.mxu0  ;;  %v4491_v34 = vpop.f32.mrf.mxu1 }
 0x218   : > { %v3410_v55 = vadd.f32 %v4468_v53, %v1838_v41  ;;  %4761 = vmatpush3.bf16.msra.mxu0 %v5218_v6 }
 0x219   : > { %4783 = vmatpush3.bf16.msra.mxu1 %v5219_v7  ;;  %v4470_v35 = vpop.f32.mrf.mxu0  ;;  %v4492_v58 = vpop.f32.mrf.mxu1  ;;  %4762 = vmatprep.subr.bf16.mxu0 %v5220_v24 }
 0x21a   : > { %v3450_v61 = vadd.f32 %v4490_v54, %v3410_v55  ;;  %4784 = vmatprep.subr.bf16.mxu1 %v5221_v33 }
 0x21c   : > { %4763 = vmatpush3.bf16.msra.mxu0 %v5222_v57 }
 0x21d   : > { %4785 = vmatpush3.bf16.msra.mxu1 %v5223_v59  ;;  %4764 = vmatprep.subr.bf16.mxu0 %v5224_v60 }
 0x21e   : > { %4786 = vmatprep.subr.bf16.mxu1 %v5225_v32 }
 0x220   : > { %4765 = vmatpush3.bf16.msra.mxu0 %v5226_v56 }
 0x221   : > { %4787 = vmatpush3.bf16.msra.mxu1 %v5227_v62  ;;  %4766 = vmatprep.subr.bf16.mxu0 %v5228_v63 }
 0x222   : > { %4788 = vmatprep.subr.bf16.mxu1 %v5229_v15 }
 0x224   : > { %4767 = vmatpush3.bf16.msra.mxu0 %v5230_v16 }
 0x225   : > { %4789 = vmatpush3.bf16.msra.mxu1 %v5231_v0  ;;  %4768 = vmatprep.subr.bf16.mxu0 %v5232_v1 }
 0x226   : > { %4790 = vmatprep.subr.bf16.mxu1 %v5233_v17 }
 0x228   : > { %4769 = vmatpush3.bf16.msra.mxu0 %v5234_v3 }
 0x229   : > { %4791 = vmatpush3.bf16.msra.mxu1 %v5235_v4  ;;  %4770 = vmatprep.subr.bf16.mxu0 %v5236_v46 }
 0x22a   : > { %4792 = vmatprep.subr.bf16.mxu1 %v5237_v8 }
 0x22c   : > { %4771 = vmatpush3.bf16.msra.mxu0 %v5238_v9 }
 0x22d   : > { %4793 = vmatpush3.bf16.msra.mxu1 %v5239_v10  ;;  %4772 = vmatprep.subr.bf16.mxu0 %v5240_v11 }
 0x22e   : > { %4794 = vmatprep.subr.bf16.mxu1 %v5241_v18 }
 0x230   : > { %4773 = vmatpush3.bf16.msra.mxu0 %v5242_v19 }
 0x231   : > { %4795 = vmatpush3.bf16.msra.mxu1 %v5243_v20 }
 0x233   : > { %v4510_v27 = vpop.f32.mrf.mxu0  ;;  %v4532_v28 = vpop.f32.mrf.mxu1  ;;  %3968 = vmatmul.mubr.bf16.vlgmr.msra.gmra.mxu0 %v1322_v50 }
 0x234   : > { %4008 = vmatmul.mubr.bf16.vlgmr.msra.gmra.mxu1 %v1324_v21 }
 0x235   : > { %v4511_v29 = vpop.f32.mrf.mxu0  ;;  %v4533_v30 = vpop.f32.mrf.mxu1 }
 0x236   : > { %v4512_v12 = vadd.f32 %v4511_v29, %v4510_v27  ;;  %v4534_v31 = vadd.f32 %v4533_v30, %v4532_v28 }
 0x237   : > { %v4513_v13 = vpop.f32.mrf.mxu0  ;;  %v4535_v14 = vpop.f32.mrf.mxu1 }
 0x238   : > { %v3490_v37 = vadd.f32 %v4512_v12, %v3450_v61 }
 0x239   : > { %v4514_v38 = vpop.f32.mrf.mxu0  ;;  %v4536_v40 = vpop.f32.mrf.mxu1 }
 0x23a   : > { %v3530_v39 = vadd.f32 %v4534_v31, %v3490_v37 }
 0x253   : > { %v4554_v42 = vpop.f32.mrf.mxu0 }
 0x254   : > { %v4576_v43 = vpop.f32.mrf.mxu1 }
 0x255   : > { %v4555_v25 = vpop.f32.mrf.mxu0 }
 0x256   : > { %v4556_v44 = vadd.f32 %v4555_v25, %v4554_v42  ;;  %v4577_v2 = vpop.f32.mrf.mxu1 }
 0x257   : > { %v4578_v26 = vadd.f32 %v4577_v2, %v4576_v43  ;;  %v4557_v51 = vpop.f32.mrf.mxu0 }
 0x258   : > { %v3570_v45 = vadd.f32 %v4556_v44, %v3530_v39  ;;  %v4579_v47 = vpop.f32.mrf.mxu1 }
 0x259   : > { %v4558_v48 = vpop.f32.mrf.mxu0 }
 0x25a   : > { %v3610_v49 = vadd.f32 %v4578_v26, %v3570_v45  ;;  %v4580_v5 = vpop.f32.mrf.mxu1 }
 0x273   : > { %v4598_v22 = vpop.f32.mrf.mxu0 }
 0x274   : > { %v4620_v6 = vpop.f32.mrf.mxu1 }
 0x275   : > { %v4599_v41 = vpop.f32.mrf.mxu0 }
 0x276   : > { %v4600_v23 = vadd.f32 %v4599_v41, %v4598_v22  ;;  %v4621_v52 = vpop.f32.mrf.mxu1 }
 0x277   : > { %v4622_v7 = vadd.f32 %v4621_v52, %v4620_v6  ;;  %v4601_v24 = vpop.f32.mrf.mxu0 }
 0x278   : > { %v3650_v53 = vadd.f32 %v4600_v23, %v3610_v49  ;;  %v4623_v54 = vpop.f32.mrf.mxu1 }
 0x279   : > { %v4602_v33 = vpop.f32.mrf.mxu0 }
 0x27a   : > { %v3690_v36 = vadd.f32 %v4622_v7, %v3650_v53  ;;  %v4624_v34 = vpop.f32.mrf.mxu1 }
 0x293   : > { %v4642_v55 = vpop.f32.mrf.mxu0 }
 0x294   : > { %v4664_v57 = vpop.f32.mrf.mxu1 }
 0x295   : > { %v4643_v35 = vpop.f32.mrf.mxu0 }
 0x296   : > { %v4644_v58 = vadd.f32 %v4643_v35, %v4642_v55  ;;  %v4665_v59 = vpop.f32.mrf.mxu1 }
 0x297   : > { %v4666_v60 = vadd.f32 %v4665_v59, %v4664_v57  ;;  %v4645_v61 = vpop.f32.mrf.mxu0 }
 0x298   : > { %v3730_v32 = vadd.f32 %v4644_v58, %v3690_v36  ;;  %v4667_v56 = vpop.f32.mrf.mxu1 }
 0x299   : > { %v4646_v62 = vpop.f32.mrf.mxu0 }
 0x29a   : > { %v3770_v63 = vadd.f32 %v4666_v60, %v3730_v32  ;;  %v4668_v15 = vpop.f32.mrf.mxu1 }
 0x2b3   : > { %v4686_v16 = vpop.f32.mrf.mxu0 }
 0x2b4   : > { %v4708_v0 = vpop.f32.mrf.mxu1 }
 0x2b5   : > { %v4687_v1 = vpop.f32.mrf.mxu0 }
 0x2b6   : > { %v4709_v17 = vpop.f32.mrf.mxu1  ;;  %v4688_v27 = vadd.f32 %v4687_v1, %v4686_v16 }
 0x2b7   : > { %v4689_v3 = vpop.f32.mrf.mxu0  ;;  %v4710_v29 = vadd.f32 %v4709_v17, %v4708_v0 }
 0x2b8   : > { %v4711_v4 = vpop.f32.mrf.mxu1  ;;  %v3810_v28 = vadd.f32 %v4688_v27, %v3770_v63 }
 0x2b9   : > { %v4690_v46 = vpop.f32.mrf.mxu0 }
 0x2ba   : > { %v4712_v8 = vpop.f32.mrf.mxu1  ;;  %v3850_v12 = vadd.f32 %v4710_v29, %v3810_v28 }
 0x2d3   : > { %v4730_v9 = vpop.f32.mrf.mxu0 }
 0x2d4   : > { %v4752_v10 = vpop.f32.mrf.mxu1 }
 0x2d5   : > { %v4731_v11 = vpop.f32.mrf.mxu0 }
 0x2d6   : > { %v4753_v18 = vpop.f32.mrf.mxu1  ;;  %v4732_v30 = vadd.f32 %v4731_v11, %v4730_v9 }
 0x2d7   : > { %v4733_v19 = vpop.f32.mrf.mxu0  ;;  %v4754_v14 = vadd.f32 %v4753_v18, %v4752_v10 }
 0x2d8   : > { %v4755_v20 = vpop.f32.mrf.mxu1  ;;  %v3890_v31 = vadd.f32 %v4732_v30, %v3850_v12 }
 0x2d9   : > { %v4734_v50 = vpop.f32.mrf.mxu0 }
 0x2da   : > { %v4756_v21 = vpop.f32.mrf.mxu1  ;;  %v3930_v40 = vadd.f32 %v4754_v14, %v3890_v31 }
 0x2f3   : > { %v4774_v13 = vpop.f32.mrf.mxu0 }
 0x2f4   : > { %v4796_v37 = vpop.f32.mrf.mxu1 }
 0x2f5   : > { %v4775_v38 = vpop.f32.mrf.mxu0 }
 0x2f6   : > { %v4776_v39 = vadd.f32 %v4775_v38, %v4774_v13  ;;  %v4797_v42 = vpop.f32.mrf.mxu1 }
 0x2f7   : > { %v4777_v43 = vpop.f32.mrf.mxu0  ;;  %v4798_v44 = vadd.f32 %v4797_v42, %v4796_v37 }
 0x2f8   : > { %v3970_v25 = vadd.f32 %v4776_v39, %v3930_v40  ;;  %v4799_v2 = vpop.f32.mrf.mxu1 }
 0x2f9   : > { %v4778_v26 = vpop.f32.mrf.mxu0 }
 0x2fa   : > { %v4010_v51 = vadd.f32 %v4798_v44, %v3970_v25  ;;  %v4800_v45 = vpop.f32.mrf.mxu1 }
 0x2fc   : > { %4016 = vst.msk [vmem:[%s216_s26] sm:$0x1] %vm4015_vm0, %v4010_v51 }
 0x2fd   : > { %5257 = shalt.err (!%p5254_p3)
}
 0x2fe   : > { %s5258_s13 = scalar_lea.hbm %s4028_s8, 16  ;;  %s5262_s16 = scalar_lea.hbm %s6693_s5, 32 }
 0x2ff   : > { %p5259_p4 = scmp.ne.s32.totalorder %s4028_s8, %s5258_s13  ;;  %p5263_p9 = scmp.lt.s32.totalorder %s4028_s8, %s6693_s5 }
 0x300   : > { %p5264_p10 = scmp.lt.s32.totalorder %s5262_s16, %s5258_s13 }
 0x301   : > { %p5260_p7 = pnand %p5259_p4, %p5377_p5 }
 0x302   : > { %p5265_p11 = por %p5264_p10, %p5263_p9 }
 0x303   : > { %p5261_p8 = pneg %p5260_p7 }
 0x305   : > { %p5266_p12 = pnand %p5265_p11, %p5261_p8 }
 0x307   : > { %5269 = shalt.err (!%p5266_p12)
}
 0x308   : > { %4803 = dma.vmem_to_hbm [thread:$0]  (%p5377_p5), %s4031_s30, 16, %s4028_s8, %s4018_s9  }
 0x309 PF: > { %p4809_p13 = scmp.ge.s32.totalorder %s5304_s21, 2  ;;  %s4042_s23 = sand.u32 1, %s5292_s18  }
 0x30a   : > { %s4043_s26 = scalar_lea.sflag [#allocation3], %s4042_s23 }
 0x30b   : > { %p4806_p0 = pnand %p4809_p13, %p5381_p6 }
 0x30d   : > { %p4807_p1 = pneg %p4806_p0 }
 0x30f   : > { %5287 = dma.done.wait (%p4807_p1), %s4043_s26, 16  }
 0x310   : > { %5289 = vsyncadd (%p4807_p1), %s4043_s26, 4294967280  ;;  %p15_p2 = scmp.ge.s32.totalorder %s5364_s24, 4   ;;  %s6696_s18 = smov %s5296_s19 }
 0x311   : > { %s6697_s19 = smov %s5300_s20  ;;  %s6698_s20 = smov %s5375_s27 }
 0x312   : > { %s6699_s21 = smov %s5364_s24  ;;  %17 = sbr.rel (!%p15_p2) target bundleno = 3 (0x3), region = 86 }
 0x317   :  { %4047 = vsyncpa [#allocation3], 1 }
 0x318   :  { %4049 = vsyncpa [#allocation3 + $0x1], 1 }

</bundles_post_ra>
